<compile_context>
chip_gen: v7x
topology: tpu7x:2x2x1
jax: 0.10.0
libtpu: 0.0.40
codegen_flags: <defaults>
</compile_context>

<pallas_src>
import functools
import math

import jax
import jax.numpy as jnp
from jax import lax
from jax.experimental import pallas as pl
from jax.experimental.pallas import tpu as pltpu


_INV_SQRT2 = 0.7071067811865476
_NEG_LARGE = -1.0e30   # finite "-inf" so exp()/max() stay NaN-free with additive masks


# ----------------------------------------------------------------------------
# Hardware-derived knobs (queried once, cached)
# ----------------------------------------------------------------------------
@functools.lru_cache(maxsize=None)
def _vmem_capacity():
    try:
        return int(pltpu.get_tpu_info().vmem_capacity_bytes)
    except Exception:
        return 64 * 1024 * 1024          # conservative fallback (v7x per-core VMEM)


@functools.lru_cache(maxsize=None)
def _vmem_limit():
    # ~48 MiB on v7x (64 MiB physical), ~96 MiB on v5e/v6e (128 MiB physical)
    return min(_vmem_capacity() * 3 // 4, 100 * 1024 * 1024)


@functools.lru_cache(maxsize=None)
def _compiler_params(semantics):
    return pltpu.CompilerParams(dimension_semantics=semantics,
                                vmem_limit_bytes=_vmem_limit())


@functools.lru_cache(maxsize=None)
def _row_tile_cap():
    # v7x (64 MiB VMEM): cap row tiles at 256; v5e/v6e (128 MiB): 512 hits ~85% HBM roofline.
    return 512 if _vmem_capacity() >= 128 * 1024 * 1024 else 256


def _row_tile(m):
    """Fixed large row tile; small inputs split in two so the grid has >=2 steps."""
    cap = _row_tile_cap()
    if m >= 2 * cap:
        return cap
    half = -(-m // 2)
    return max(8, -(-half // 8) * 8)


def _seq_tile(n, cap, quantum):
    """Largest divisor of n that is <= cap and a multiple of quantum, else n (full dim)."""
    cands = [t for t in range(quantum, min(cap, n) + 1, quantum) if n % t == 0]
    return max(cands) if cands else n


def _pad_rows(x, mp):
    m = x.shape[0]
    return x if m == mp else jnp.pad(x, ((0, mp - m), (0, 0)))


def _const_spec(shape):
    """BlockSpec for a block that is identical at every grid step (weights / biases):
    single-buffered so it is fetched once and never re-DMA'd nor double-buffered."""
    nd = len(shape)
    return pl.BlockSpec(shape, lambda *_: (0,) * nd, pipeline_mode=pl.Buffered(1))


# ----------------------------------------------------------------------------
# In-kernel helpers
# ----------------------------------------------------------------------------
def _mm_pre(x_bf16, w_bf16):
    """y = x @ w.T, no materialized transpose; bf16 MXU inputs, f32 accumulation."""
    return lax.dot_general(x_bf16, w_bf16,
                           dimension_numbers=(((1,), (1,)), ((), ())),
                           preferred_element_type=jnp.float32)


def _mm_t(x, w_bf16):
    return _mm_pre(x.astype(jnp.bfloat16), w_bf16)


def _layernorm(z, g, b, eps=1e-5):
    mu = jnp.mean(z, axis=-1, keepdims=True)
    var = jnp.mean((z - mu) ** 2, axis=-1, keepdims=True)
    return (z - mu) * lax.rsqrt(var + eps) * g + b


# ----------------------------------------------------------------------------
# Pallas kernels
# ----------------------------------------------------------------------------
def _qkv_kernel(x_ref, wq_ref, wk_ref, wv_ref, bq_ref, bk_ref, bv_ref,
                q_ref, k_ref, v_ref):
    x = x_ref[...].astype(jnp.bfloat16)
    q_ref[...] = (_mm_pre(x, wq_ref[...]) + bq_ref[...]).astype(q_ref.dtype)
    k_ref[...] = (_mm_pre(x, wk_ref[...]) + bk_ref[...]).astype(k_ref.dtype)
    v_ref[...] = (_mm_pre(x, wv_ref[...]) + bv_ref[...]).astype(v_ref.dtype)


def _flash_attn_kernel(*refs, nhead, dh, has_mask):
    if has_mask:
        q_ref, k_ref, v_ref, mask_ref, o_ref, m_sc, l_sc, acc_sc = refs
    else:
        q_ref, k_ref, v_ref, o_ref, m_sc, l_sc, acc_sc = refs
        mask_ref = None

    ki = pl.program_id(2)

    @pl.when(ki == 0)
    def _():
        m_sc[...] = jnp.full_like(m_sc, _NEG_LARGE)
        l_sc[...] = jnp.zeros_like(l_sc)
        acc_sc[...] = jnp.zeros_like(acc_sc)

    q = q_ref[0]                                   # (tq, E) bf16 (scale folded into Wq)
    k = k_ref[0]                                   # (tk, E) bf16
    v = v_ref[0]                                   # (tk, E) bf16
    mask = mask_ref[...] if has_mask else None     # (tq, tk) f32 additive

    for h in range(nhead):                         # static unroll over heads
        sl = slice(h * dh, (h + 1) * dh)
        s = lax.dot_general(q[:, sl], k[:, sl],
                            dimension_numbers=(((1,), (1,)), ((), ())),
                            preferred_element_type=jnp.float32)        # (tq, tk)
        if has_mask:
            s = s + mask
        m_prev = m_sc[h]
        m_new = jnp.maximum(m_prev, jnp.max(s, axis=-1, keepdims=True))
        alpha = jnp.exp(m_prev - m_new)
        p = jnp.exp(s - m_new)
        l_sc[h] = alpha * l_sc[h] + jnp.sum(p, axis=-1, keepdims=True)
        pv = lax.dot_general(p.astype(jnp.bfloat16), v[:, sl],
                             dimension_numbers=(((1,), (0,)), ((), ())),
                             preferred_element_type=jnp.float32)       # (tq, dh)
        acc_sc[h] = alpha * acc_sc[h] + pv
        m_sc[h] = m_new

    @pl.when(ki == pl.num_programs(2) - 1)
    def _():
        parts = [acc_sc[h] * pl.reciprocal(l_sc[h], approx=True) for h in range(nhead)]
        o_ref[0] = jnp.concatenate(parts, axis=-1).astype(o_ref.dtype)   # lane-dense store


def _out_res_ln_kernel(a_ref, w_ref, b_ref, res_ref, g_ref, beta_ref, o_ref):
    # src = LayerNorm(res + (attn @ Wo^T + bo))
    z = res_ref[...] + _mm_t(a_ref[...], w_ref[...]) + b_ref[...]
    o_ref[...] = _layernorm(z, g_ref[...], beta_ref[...]).astype(o_ref.dtype)


def _ffn_res_ln_kernel(x_ref, w1_ref, b1_ref, w2_ref, b2_ref, g_ref, beta_ref, o_ref):
    # src = LayerNorm(x + W2 @ gelu(W1 @ x + b1) + b2)
    x = x_ref[...]
    h = _mm_t(x, w1_ref[...]) + b1_ref[...]
    # exact erf GELU (matches nn.GELU default); tanh/EUP variant possible if VALU-bound
    h = 0.5 * h * (1.0 + lax.erf(h * _INV_SQRT2))
    y = _mm_t(h, w2_ref[...]) + b2_ref[...]
    o_ref[...] = _layernorm(x + y, g_ref[...], beta_ref[...]).astype(o_ref.dtype)


# ----------------------------------------------------------------------------
# Pallas wrappers
# ----------------------------------------------------------------------------
def qkv_pallas(x, wq, wk, wv, bq, bk, bv):
    M, E = x.shape
    tm = _row_tile(M)
    Mp = pl.cdiv(M, tm) * tm
    row = pl.BlockSpec((tm, E), lambda i: (i, 0))
    w_spec, b_spec = _const_spec((E, E)), _const_spec((1, E))
    q, k, v = pl.pallas_call(
        _qkv_kernel,
        out_shape=tuple(jax.ShapeDtypeStruct((Mp, E), jnp.bfloat16) for _ in range(3)),
        grid=(Mp // tm,),
        in_specs=[row, w_spec, w_spec, w_spec, b_spec, b_spec, b_spec],
        out_specs=(row, row, row),
        compiler_params=_compiler_params(("parallel",)),
    )(_pad_rows(x, Mp), wq, wk, wv, bq, bk, bv)
    if Mp != M:
        q, k, v = q[:M], k[:M], v[:M]
    return q, k, v


def attention_pallas(q, k, v, mask, *, nhead):
    B, T, E = q.shape
    Dh = E // nhead
    has_mask = mask is not None
    tq = _seq_tile(T, 256, 8)
    tk = _seq_tile(T, 512, 128) if has_mask else _seq_tile(T, 512, 8)

    kernel = functools.partial(_flash_attn_kernel, nhead=nhead, dh=Dh, has_mask=has_mask)
    q_spec = pl.BlockSpec((1, tq, E), lambda b, qi, ki: (b, qi, 0))
    kv_spec = pl.BlockSpec((1, tk, E), lambda b, qi, ki: (b, ki, 0))
    in_specs = [q_spec, kv_spec, kv_spec]
    operands = [q, k, v]
    if has_mask:
        in_specs.append(pl.BlockSpec((tq, tk), lambda b, qi, ki: (qi, ki)))
        operands.append(mask.astype(jnp.float32))

    return pl.pallas_call(
        kernel,
        out_shape=jax.ShapeDtypeStruct((B, T, E), jnp.bfloat16),
        grid=(B, T // tq, T // tk),
        in_specs=in_specs,
        out_specs=pl.BlockSpec((1, tq, E), lambda b, qi, ki: (b, qi, 0)),
        scratch_shapes=[pltpu.VMEM((nhead, tq, 1), jnp.float32),   # running max
                        pltpu.VMEM((nhead, tq, 1), jnp.float32),   # running denom
                        pltpu.VMEM((nhead, tq, Dh), jnp.float32)], # running PV accumulator
        compiler_params=_compiler_params(("parallel", "parallel", "arbitrary")),
    )(*operands)


def out_res_ln_pallas(attn, w, b, res, g, beta):
    M, E = res.shape
    tm = _row_tile(M)
    Mp = pl.cdiv(M, tm) * tm
    row = pl.BlockSpec((tm, E), lambda i: (i, 0))
    out = pl.pallas_call(
        _out_res_ln_kernel,
        out_shape=jax.ShapeDtypeStruct((Mp, E), jnp.float32),
        grid=(Mp // tm,),
        in_specs=[row, _const_spec((E, E)), _const_spec((1, E)),
                  row, _const_spec((1, E)), _const_spec((1, E))],
        out_specs=row,
        compiler_params=_compiler_params(("parallel",)),
    )(_pad_rows(attn, Mp), w, b, _pad_rows(res, Mp), g, beta)
    return out[:M] if Mp != M else out


def ffn_res_ln_pallas(x, w1, b1, w2, b2, g, beta):
    M, E = x.shape
    F = w1.shape[0]
    tm = _row_tile(M)
    Mp = pl.cdiv(M, tm) * tm
    row = pl.BlockSpec((tm, E), lambda i: (i, 0))
    out = pl.pallas_call(
        _ffn_res_ln_kernel,
        out_shape=jax.ShapeDtypeStruct((Mp, E), jnp.float32),
        grid=(Mp // tm,),
        in_specs=[row, _const_spec((F, E)), _const_spec((1, F)),
                  _const_spec((E, F)), _const_spec((1, E)),
                  _const_spec((1, E)), _const_spec((1, E))],
        out_specs=row,
        compiler_params=_compiler_params(("parallel",)),
    )(_pad_rows(x, Mp), w1, b1, w2, b2, g, beta)
    return out[:M] if Mp != M else out


# ----------------------------------------------------------------------------
# Parameter preparation (done ONCE, outside the per-step forward)
# ----------------------------------------------------------------------------
def prepare_params(params, nhead):
    """Split QKV, fold the softmax scale into Wq/bq, cast matmul weights to bf16 once."""
    E = params["o_w"].shape[0]
    scale = float(E // nhead) ** -0.5
    bf = jnp.bfloat16
    wq, wk, wv = jnp.split(params["qkv_w"], 3, axis=0)
    bq, bk, bv = jnp.split(params["qkv_b"], 3)
    F = params["ff1_w"].shape[0]
    return {
        "wq": (wq * scale).astype(bf), "wk": wk.astype(bf), "wv": wv.astype(bf),
        "bq": (bq * scale).reshape(1, E), "bk": bk.reshape(1, E), "bv": bv.reshape(1, E),
        "wo": params["o_w"].astype(bf), "bo": params["o_b"].reshape(1, E),
        "ff1_w": params["ff1_w"].astype(bf), "ff1_b": params["ff1_b"].reshape(1, F),
        "ff2_w": params["ff2_w"].astype(bf), "ff2_b": params["ff2_b"].reshape(1, E),
        "ln1_g": params["ln1_g"].reshape(1, E), "ln1_b": params["ln1_b"].reshape(1, E),
        "ln2_g": params["ln2_g"].reshape(1, E), "ln2_b": params["ln2_b"].reshape(1, E),
    }


# ----------------------------------------------------------------------------
# Forward pass (glue in plain JAX, compute in Pallas)
# ----------------------------------------------------------------------------
def encoder_layer_forward(src, prep, *, nhead, src_mask=None):
    """StandardTransformerEncoderLayer.forward (eval mode) with Pallas kernels.

    src: [T, B, E] (seq-major, as in PyTorch batch_first=False). Internally computed
    batch-major so attention BlockSpecs are clean; only two XLA transposes remain.
    """
    T, B, E = src.shape

    x = jnp.swapaxes(src, 0, 1)              # [B, T, E]  (single XLA transpose of the input)
    x2d = x.reshape(B * T, E)

    # --- self attention ---
    q, k, v = qkv_pallas(x2d, prep["wq"], prep["wk"], prep["wv"],
                         prep["bq"], prep["bk"], prep["bv"])
    q = q.reshape(B, T, E)
    k = k.reshape(B, T, E)
    v = v.reshape(B, T, E)
    attn = attention_pallas(q, k, v, src_mask, nhead=nhead)      # [B, T, E] bf16
    attn2d = attn.reshape(B * T, E)

    # --- out projection + residual + norm1 (fused) ---
    src1 = out_res_ln_pallas(attn2d, prep["wo"], prep["bo"], x2d,
                             prep["ln1_g"], prep["ln1_b"])

    # --- feed forward + residual + norm2 (fused) ---
    out = ffn_res_ln_pallas(src1, prep["ff1_w"], prep["ff1_b"],
                            prep["ff2_w"], prep["ff2_b"],
                            prep["ln2_g"], prep["ln2_b"])
    # TODO(synk): nn.Dropout layers are identity (eval mode); training-mode dropout and the
    # averaged attention-weights output of MultiheadAttention (unused by the layer) are omitted.
    return jnp.swapaxes(out.reshape(B, T, E), 0, 1)              # back to [T, B, E]


# ----------------------------------------------------------------------------
# Pure-JAX f32 reference (mirrors the PyTorch module, eval mode)
# ----------------------------------------------------------------------------
def reference_layer(src, params, nhead, src_mask):
    T, B, E = src.shape
    Dh = E // nhead
    scale = float(Dh) ** -0.5
    x2d = src.reshape(T * B, E)
    qkv = (x2d @ params["qkv_w"].T + params["qkv_b"]).reshape(T, B, 3 * E)
    q, k, v = qkv[..., :E], qkv[..., E:2 * E], qkv[..., 2 * E:]

    def heads(t):
        return t.reshape(T, B, nhead, Dh).transpose(1, 2, 0, 3).reshape(B * nhead, T, Dh)

    s = jnp.einsum("bqd,bkd->bqk", heads(q) * scale, heads(k)) + src_mask
    p = jax.nn.softmax(s, axis=-1)
    o = jnp.einsum("bqk,bkd->bqd", p, heads(v))
    o = o.reshape(B, nhead, T, Dh).transpose(2, 0, 1, 3).reshape(T * B, E)
    attn_out = o @ params["o_w"].T + params["o_b"]

    def ln(z, g, b):
        mu = z.mean(-1, keepdims=True)
        var = ((z - mu) ** 2).mean(-1, keepdims=True)
        return (z - mu) / jnp.sqrt(var + 1e-5) * g + b

    src1 = ln(x2d + attn_out, params["ln1_g"], params["ln1_b"])
    h = src1 @ params["ff1_w"].T + params["ff1_b"]
    h = 0.5 * h * (1.0 + lax.erf(h * _INV_SQRT2))
    y = h @ params["ff2_w"].T + params["ff2_b"]
    out = ln(src1 + y, params["ln2_g"], params["ln2_b"])
    return out.reshape(T, B, E)


# ----------------------------------------------------------------------------
# Deterministic parameter init (mirrors the PyTorch module's shapes / init scheme)
# ----------------------------------------------------------------------------
def init_params(key, d_model, nhead, dim_feedforward):
    E, F = d_model, dim_feedforward
    ks = jax.random.split(key, 6)

    def u(k, shape, bound):
        return jax.random.uniform(k, shape, jnp.float32, -bound, bound)

    xavier = math.sqrt(6.0 / (E + 3 * E))
    return {
        "qkv_w": u(ks[0], (3 * E, E), xavier),
        "qkv_b": jnp.zeros((3 * E,), jnp.float32),
        "o_w": u(ks[1], (E, E), 1.0 / math.sqrt(E)),
        "o_b": jnp.zeros((E,), jnp.float32),
        "ff1_w": u(ks[2], (F, E), 1.0 / math.sqrt(E)),
        "ff1_b": u(ks[3], (F,), 1.0 / math.sqrt(E)),
        "ff2_w": u(ks[4], (E, F), 1.0 / math.sqrt(F)),
        "ff2_b": u(ks[5], (E,), 1.0 / math.sqrt(F)),
        "ln1_g": jnp.ones((E,), jnp.float32), "ln1_b": jnp.zeros((E,), jnp.float32),
        "ln2_g": jnp.ones((E,), jnp.float32), "ln2_b": jnp.zeros((E,), jnp.float32),
    }


# ----------------------------------------------------------------------------
if __name__ == "__main__":
    d_model, nhead, dim_feedforward = 32, 4, 64
    T, B = 8, 2

    key = jax.random.PRNGKey(0)
    kp, kx = jax.random.split(key)
    params = init_params(kp, d_model, nhead, dim_feedforward)
    prep = jax.tree_util.tree_map(jax.block_until_ready, prepare_params(params, nhead))
    src = jax.random.normal(kx, (T, B, d_model), jnp.float32)
    causal = jnp.where(jnp.tril(jnp.ones((T, T), jnp.bool_)), 0.0, -1e30).astype(jnp.float32)

    fwd = jax.jit(functools.partial(encoder_layer_forward, nhead=nhead))

    # masked (causal) variant
    out = jax.block_until_ready(fwd(src, prep, src_mask=causal))
    assert out.shape == (T, B, d_model)
    assert bool(jnp.all(jnp.isfinite(out)))
    ref = reference_layer(src, params, nhead, causal)
    max_err = float(jnp.max(jnp.abs(out - ref)))
    assert max_err < 5e-2, f"masked: max abs error too large: {max_err}"

    # mask-free variant (exercises the no-mask kernel path)
    out_nm = jax.block_until_ready(fwd(src, prep, src_mask=None))
    ref_nm = reference_layer(src, params, nhead, jnp.zeros((T, T), jnp.float32))
    max_err_nm = float(jnp.max(jnp.abs(out_nm - ref_nm)))
    assert max_err_nm < 5e-2, f"no-mask: max abs error too large: {max_err_nm}"

    print("KERNEL_OK")
</pallas_src>

<mosaic_0001>
module attributes {stable_mosaic.version = 11 : i64} {
  func.func @_qkv_kernel(%arg0: i32, %arg1: memref<8x32xf32, #tpu.memory_space<vmem>>, %arg2: memref<32x32xbf16, #tpu.memory_space<vmem>>, %arg3: memref<32x32xbf16, #tpu.memory_space<vmem>>, %arg4: memref<32x32xbf16, #tpu.memory_space<vmem>>, %arg5: memref<1x32xf32, #tpu.memory_space<vmem>>, %arg6: memref<1x32xf32, #tpu.memory_space<vmem>>, %arg7: memref<1x32xf32, #tpu.memory_space<vmem>>, %arg8: memref<8x32xbf16, #tpu.memory_space<vmem>>, %arg9: memref<8x32xbf16, #tpu.memory_space<vmem>>, %arg10: memref<8x32xbf16, #tpu.memory_space<vmem>>) attributes {dimension_semantics = [#tpu.dimension_semantics<parallel>], iteration_bounds = array<i64: 2>, scalar_prefetch = 0 : i64, scratch_operands = 0 : i64, tpu.core_type = #tpu.core_type<tc>, window_params = [{transform_indices = @transform_0, window_bounds = array<i64: 8, 32>}, {pipeline_mode = #tpu.pipeline_mode<synchronous>, transform_indices = @transform_1, window_bounds = array<i64: 32, 32>}, {pipeline_mode = #tpu.pipeline_mode<synchronous>, transform_indices = @transform_2, window_bounds = array<i64: 32, 32>}, {pipeline_mode = #tpu.pipeline_mode<synchronous>, transform_indices = @transform_3, window_bounds = array<i64: 32, 32>}, {pipeline_mode = #tpu.pipeline_mode<synchronous>, transform_indices = @transform_4, window_bounds = array<i64: 1, 32>}, {pipeline_mode = #tpu.pipeline_mode<synchronous>, transform_indices = @transform_5, window_bounds = array<i64: 1, 32>}, {pipeline_mode = #tpu.pipeline_mode<synchronous>, transform_indices = @transform_6, window_bounds = array<i64: 1, 32>}, {transform_indices = @transform_7, window_bounds = array<i64: 8, 32>}, {transform_indices = @transform_8, window_bounds = array<i64: 8, 32>}, {transform_indices = @transform_9, window_bounds = array<i64: 8, 32>}]} {
    %c0 = arith.constant 0 : index
    %c0_0 = arith.constant 0 : index
    %0 = vector.load %arg1[%c0, %c0_0] : memref<8x32xf32, #tpu.memory_space<vmem>>, vector<8x32xf32>
    %1 = arith.truncf %0 : vector<8x32xf32> to vector<8x32xbf16>
    %c0_1 = arith.constant 0 : index
    %c0_2 = arith.constant 0 : index
    %2 = vector.load %arg2[%c0_1, %c0_2] : memref<32x32xbf16, #tpu.memory_space<vmem>>, vector<32x32xbf16>
    %cst = arith.constant dense<0.000000e+00> : vector<8x32xf32>
    %3 = tpu.matmul %1, %2, %cst {dimension_numbers = #tpu.dot_dimension_numbers<[1], [1], [0], [0], [0, 0, 1, 0], [], []>} : vector<8x32xbf16>, vector<32x32xbf16>, vector<8x32xf32> -> vector<8x32xf32>
    %c0_3 = arith.constant 0 : index
    %c0_4 = arith.constant 0 : index
    %4 = vector.load %arg5[%c0_3, %c0_4] : memref<1x32xf32, #tpu.memory_space<vmem>>, vector<1x32xf32>
    %5 = vector.broadcast %4 : vector<1x32xf32> to vector<8x32xf32>
    %6 = arith.addf %3, %5 : vector<8x32xf32>
    %7 = arith.truncf %6 : vector<8x32xf32> to vector<8x32xbf16>
    %c0_5 = arith.constant 0 : index
    %c0_6 = arith.constant 0 : index
    %8 = vector.load %arg8[%c0_5, %c0_6] : memref<8x32xbf16, #tpu.memory_space<vmem>>, vector<8x32xbf16>
    tpu.vector_store %arg8[%c0_5, %c0_6], %7 {strides = array<i32>} : memref<8x32xbf16, #tpu.memory_space<vmem>>, vector<8x32xbf16>,
    %c0_7 = arith.constant 0 : index
    %c0_8 = arith.constant 0 : index
    %9 = vector.load %arg3[%c0_7, %c0_8] : memref<32x32xbf16, #tpu.memory_space<vmem>>, vector<32x32xbf16>
    %cst_9 = arith.constant dense<0.000000e+00> : vector<8x32xf32>
    %10 = tpu.matmul %1, %9, %cst_9 {dimension_numbers = #tpu.dot_dimension_numbers<[1], [1], [0], [0], [0, 0, 1, 0], [], []>} : vector<8x32xbf16>, vector<32x32xbf16>, vector<8x32xf32> -> vector<8x32xf32>
    %c0_10 = arith.constant 0 : index
    %c0_11 = arith.constant 0 : index
    %11 = vector.load %arg6[%c0_10, %c0_11] : memref<1x32xf32, #tpu.memory_space<vmem>>, vector<1x32xf32>
    %12 = vector.broadcast %11 : vector<1x32xf32> to vector<8x32xf32>
    %13 = arith.addf %10, %12 : vector<8x32xf32>
    %14 = arith.truncf %13 : vector<8x32xf32> to vector<8x32xbf16>
    %c0_12 = arith.constant 0 : index
    %c0_13 = arith.constant 0 : index
    %15 = vector.load %arg9[%c0_12, %c0_13] : memref<8x32xbf16, #tpu.memory_space<vmem>>, vector<8x32xbf16>
    tpu.vector_store %arg9[%c0_12, %c0_13], %14 {strides = array<i32>} : memref<8x32xbf16, #tpu.memory_space<vmem>>, vector<8x32xbf16>,
    %c0_14 = arith.constant 0 : index
    %c0_15 = arith.constant 0 : index
    %16 = vector.load %arg4[%c0_14, %c0_15] : memref<32x32xbf16, #tpu.memory_space<vmem>>, vector<32x32xbf16>
    %cst_16 = arith.constant dense<0.000000e+00> : vector<8x32xf32>
    %17 = tpu.matmul %1, %16, %cst_16 {dimension_numbers = #tpu.dot_dimension_numbers<[1], [1], [0], [0], [0, 0, 1, 0], [], []>} : vector<8x32xbf16>, vector<32x32xbf16>, vector<8x32xf32> -> vector<8x32xf32>
    %c0_17 = arith.constant 0 : index
    %c0_18 = arith.constant 0 : index
    %18 = vector.load %arg7[%c0_17, %c0_18] : memref<1x32xf32, #tpu.memory_space<vmem>>, vector<1x32xf32>
    %19 = vector.broadcast %18 : vector<1x32xf32> to vector<8x32xf32>
    %20 = arith.addf %17, %19 : vector<8x32xf32>
    %21 = arith.truncf %20 : vector<8x32xf32> to vector<8x32xbf16>
    %c0_19 = arith.constant 0 : index
    %c0_20 = arith.constant 0 : index
    %22 = vector.load %arg10[%c0_19, %c0_20] : memref<8x32xbf16, #tpu.memory_space<vmem>>, vector<8x32xbf16>
    tpu.vector_store %arg10[%c0_19, %c0_20], %21 {strides = array<i32>} : memref<8x32xbf16, #tpu.memory_space<vmem>>, vector<8x32xbf16>,
    return
  }
  func.func @transform_0(%arg0: i32) -> (i32, i32) {
    %c0_i32 = arith.constant 0 : i32
    %c0_i32_0 = arith.constant 0 : i32
    return %arg0, %c0_i32 : i32, i32
  }
  func.func @transform_1(%arg0: i32) -> (i32, i32) {
    %c0_i32 = arith.constant 0 : i32
    %c0_i32_0 = arith.constant 0 : i32
    %c0_i32_1 = arith.constant 0 : i32
    return %c0_i32, %c0_i32_0 : i32, i32
  }
  func.func @transform_2(%arg0: i32) -> (i32, i32) {
    %c0_i32 = arith.constant 0 : i32
    %c0_i32_0 = arith.constant 0 : i32
    %c0_i32_1 = arith.constant 0 : i32
    return %c0_i32, %c0_i32_0 : i32, i32
  }
  func.func @transform_3(%arg0: i32) -> (i32, i32) {
    %c0_i32 = arith.constant 0 : i32
    %c0_i32_0 = arith.constant 0 : i32
    %c0_i32_1 = arith.constant 0 : i32
    return %c0_i32, %c0_i32_0 : i32, i32
  }
  func.func @transform_4(%arg0: i32) -> (i32, i32) {
    %c0_i32 = arith.constant 0 : i32
    %c0_i32_0 = arith.constant 0 : i32
    %c0_i32_1 = arith.constant 0 : i32
    return %c0_i32, %c0_i32_0 : i32, i32
  }
  func.func @transform_5(%arg0: i32) -> (i32, i32) {
    %c0_i32 = arith.constant 0 : i32
    %c0_i32_0 = arith.constant 0 : i32
    %c0_i32_1 = arith.constant 0 : i32
    return %c0_i32, %c0_i32_0 : i32, i32
  }
  func.func @transform_6(%arg0: i32) -> (i32, i32) {
    %c0_i32 = arith.constant 0 : i32
    %c0_i32_0 = arith.constant 0 : i32
    %c0_i32_1 = arith.constant 0 : i32
    return %c0_i32, %c0_i32_0 : i32, i32
  }
  func.func @transform_7(%arg0: i32) -> (i32, i32) {
    %c0_i32 = arith.constant 0 : i32
    %c0_i32_0 = arith.constant 0 : i32
    return %arg0, %c0_i32 : i32, i32
  }
  func.func @transform_8(%arg0: i32) -> (i32, i32) {
    %c0_i32 = arith.constant 0 : i32
    %c0_i32_0 = arith.constant 0 : i32
    return %arg0, %c0_i32 : i32, i32
  }
  func.func @transform_9(%arg0: i32) -> (i32, i32) {
    %c0_i32 = arith.constant 0 : i32
    %c0_i32_0 = arith.constant 0 : i32
    return %arg0, %c0_i32 : i32, i32
  }
}

module attributes {stable_mosaic.version = 11 : i64} {
  func.func @_out_res_ln_kernel(%arg0: i32, %arg1: memref<8x32xbf16, #tpu.memory_space<vmem>>, %arg2: memref<32x32xbf16, #tpu.memory_space<vmem>>, %arg3: memref<1x32xf32, #tpu.memory_space<vmem>>, %arg4: memref<8x32xf32, #tpu.memory_space<vmem>>, %arg5: memref<1x32xf32, #tpu.memory_space<vmem>>, %arg6: memref<1x32xf32, #tpu.memory_space<vmem>>, %arg7: memref<8x32xf32, #tpu.memory_space<vmem>>) attributes {dimension_semantics = [#tpu.dimension_semantics<parallel>], iteration_bounds = array<i64: 2>, scalar_prefetch = 0 : i64, scratch_operands = 0 : i64, tpu.core_type = #tpu.core_type<tc>, window_params = [{transform_indices = @transform_0, window_bounds = array<i64: 8, 32>}, {pipeline_mode = #tpu.pipeline_mode<synchronous>, transform_indices = @transform_1, window_bounds = array<i64: 32, 32>}, {pipeline_mode = #tpu.pipeline_mode<synchronous>, transform_indices = @transform_2, window_bounds = array<i64: 1, 32>}, {transform_indices = @transform_3, window_bounds = array<i64: 8, 32>}, {pipeline_mode = #tpu.pipeline_mode<synchronous>, transform_indices = @transform_4, window_bounds = array<i64: 1, 32>}, {pipeline_mode = #tpu.pipeline_mode<synchronous>, transform_indices = @transform_5, window_bounds = array<i64: 1, 32>}, {transform_indices = @transform_6, window_bounds = array<i64: 8, 32>}]} {
    %c0 = arith.constant 0 : index
    %c0_0 = arith.constant 0 : index
    %0 = vector.load %arg4[%c0, %c0_0] : memref<8x32xf32, #tpu.memory_space<vmem>>, vector<8x32xf32>
    %c0_1 = arith.constant 0 : index
    %c0_2 = arith.constant 0 : index
    %1 = vector.load %arg1[%c0_1, %c0_2] : memref<8x32xbf16, #tpu.memory_space<vmem>>, vector<8x32xbf16>
    %c0_3 = arith.constant 0 : index
    %c0_4 = arith.constant 0 : index
    %2 = vector.load %arg2[%c0_3, %c0_4] : memref<32x32xbf16, #tpu.memory_space<vmem>>, vector<32x32xbf16>
    %cst = arith.constant dense<0.000000e+00> : vector<8x32xf32>
    %3 = tpu.matmul %1, %2, %cst {dimension_numbers = #tpu.dot_dimension_numbers<[1], [1], [0], [0], [0, 0, 1, 0], [], []>} : vector<8x32xbf16>, vector<32x32xbf16>, vector<8x32xf32> -> vector<8x32xf32>
    %4 = arith.addf %0, %3 : vector<8x32xf32>
    %c0_5 = arith.constant 0 : index
    %c0_6 = arith.constant 0 : index
    %5 = vector.load %arg3[%c0_5, %c0_6] : memref<1x32xf32, #tpu.memory_space<vmem>>, vector<1x32xf32>
    %6 = vector.broadcast %5 : vector<1x32xf32> to vector<8x32xf32>
    %7 = arith.addf %4, %6 : vector<8x32xf32>
    %c0_7 = arith.constant 0 : index
    %c0_8 = arith.constant 0 : index
    %8 = vector.load %arg5[%c0_7, %c0_8] : memref<1x32xf32, #tpu.memory_space<vmem>>, vector<1x32xf32>
    %c0_9 = arith.constant 0 : index
    %c0_10 = arith.constant 0 : index
    %9 = vector.load %arg6[%c0_9, %c0_10] : memref<1x32xf32, #tpu.memory_space<vmem>>, vector<1x32xf32>
    %cst_11 = arith.constant dense<0.000000e+00> : vector<8xf32>
    %10 = vector.multi_reduction <add>, %7, %cst_11 [1] : vector<8x32xf32> to vector<8xf32>
    %11 = vector.shape_cast %10 : vector<8xf32> to vector<8x1xf32>
    %cst_12 = arith.constant 3.200000e+01 : f32
    %12 = vector.broadcast %cst_12 : f32 to vector<8x1xf32>
    %13 = arith.divf %11, %12 : vector<8x1xf32>
    %14 = vector.broadcast %13 : vector<8x1xf32> to vector<8x32xf32>
    %15 = arith.subf %7, %14 : vector<8x32xf32>
    %16 = arith.mulf %15, %15 : vector<8x32xf32>
    %cst_13 = arith.constant dense<0.000000e+00> : vector<8xf32>
    %17 = vector.multi_reduction <add>, %16, %cst_13 [1] : vector<8x32xf32> to vector<8xf32>
    %18 = vector.shape_cast %17 : vector<8xf32> to vector<8x1xf32>
    %cst_14 = arith.constant 3.200000e+01 : f32
    %19 = vector.broadcast %cst_14 : f32 to vector<8x1xf32>
    %20 = arith.divf %18, %19 : vector<8x1xf32>
    %21 = vector.broadcast %13 : vector<8x1xf32> to vector<8x32xf32>
    %22 = arith.subf %7, %21 : vector<8x32xf32>
    %cst_15 = arith.constant 9.99999974E-6 : f32
    %23 = vector.broadcast %cst_15 : f32 to vector<8x1xf32>
    %24 = arith.addf %20, %23 : vector<8x1xf32>
    %25 = math.rsqrt %24 : vector<8x1xf32>
    %26 = vector.broadcast %25 : vector<8x1xf32> to vector<8x32xf32>
    %27 = arith.mulf %22, %26 : vector<8x32xf32>
    %28 = vector.broadcast %8 : vector<1x32xf32> to vector<8x32xf32>
    %29 = arith.mulf %27, %28 : vector<8x32xf32>
    %30 = vector.broadcast %9 : vector<1x32xf32> to vector<8x32xf32>
    %31 = arith.addf %29, %30 : vector<8x32xf32>
    %c0_16 = arith.constant 0 : index
    %c0_17 = arith.constant 0 : index
    %32 = vector.load %arg7[%c0_16, %c0_17] : memref<8x32xf32, #tpu.memory_space<vmem>>, vector<8x32xf32>
    tpu.vector_store %arg7[%c0_16, %c0_17], %31 {strides = array<i32>} : memref<8x32xf32, #tpu.memory_space<vmem>>, vector<8x32xf32>,
    return
  }
  func.func @transform_0(%arg0: i32) -> (i32, i32) {
    %c0_i32 = arith.constant 0 : i32
    %c0_i32_0 = arith.constant 0 : i32
    return %arg0, %c0_i32 : i32, i32
  }
  func.func @transform_1(%arg0: i32) -> (i32, i32) {
    %c0_i32 = arith.constant 0 : i32
    %c0_i32_0 = arith.constant 0 : i32
    %c0_i32_1 = arith.constant 0 : i32
    return %c0_i32, %c0_i32_0 : i32, i32
  }
  func.func @transform_2(%arg0: i32) -> (i32, i32) {
    %c0_i32 = arith.constant 0 : i32
    %c0_i32_0 = arith.constant 0 : i32
    %c0_i32_1 = arith.constant 0 : i32
    return %c0_i32, %c0_i32_0 : i32, i32
  }
  func.func @transform_3(%arg0: i32) -> (i32, i32) {
    %c0_i32 = arith.constant 0 : i32
    %c0_i32_0 = arith.constant 0 : i32
    return %arg0, %c0_i32 : i32, i32
  }
  func.func @transform_4(%arg0: i32) -> (i32, i32) {
    %c0_i32 = arith.constant 0 : i32
    %c0_i32_0 = arith.constant 0 : i32
    %c0_i32_1 = arith.constant 0 : i32
    return %c0_i32, %c0_i32_0 : i32, i32
  }
  func.func @transform_5(%arg0: i32) -> (i32, i32) {
    %c0_i32 = arith.constant 0 : i32
    %c0_i32_0 = arith.constant 0 : i32
    %c0_i32_1 = arith.constant 0 : i32
    return %c0_i32, %c0_i32_0 : i32, i32
  }
  func.func @transform_6(%arg0: i32) -> (i32, i32) {
    %c0_i32 = arith.constant 0 : i32
    %c0_i32_0 = arith.constant 0 : i32
    return %arg0, %c0_i32 : i32, i32
  }
}

module attributes {stable_mosaic.version = 11 : i64} {
  func.func @_flash_attn_kernel(%arg0: i32, %arg1: i32, %arg2: i32, %arg3: memref<1x8x32xbf16, #tpu.memory_space<vmem>>, %arg4: memref<1x8x32xbf16, #tpu.memory_space<vmem>>, %arg5: memref<1x8x32xbf16, #tpu.memory_space<vmem>>, %arg6: memref<8x8xf32, #tpu.memory_space<vmem>>, %arg7: memref<1x8x32xbf16, #tpu.memory_space<vmem>>, %arg8: memref<4x8x1xf32, #tpu.memory_space<vmem>>, %arg9: memref<4x8x1xf32, #tpu.memory_space<vmem>>, %arg10: memref<4x8x8xf32, #tpu.memory_space<vmem>>) attributes {dimension_semantics = [#tpu.dimension_semantics<parallel>, #tpu.dimension_semantics<parallel>, #tpu.dimension_semantics<arbitrary>], iteration_bounds = array<i64: 2, 1, 1>, scalar_prefetch = 0 : i64, scratch_operands = 3 : i64, tpu.core_type = #tpu.core_type<tc>, window_params = [{transform_indices = @transform_0, window_bounds = array<i64: 1, 8, 32>}, {transform_indices = @transform_1, window_bounds = array<i64: 1, 8, 32>}, {transform_indices = @transform_2, window_bounds = array<i64: 1, 8, 32>}, {transform_indices = @transform_3, window_bounds = array<i64: 8, 8>}, {transform_indices = @transform_4, window_bounds = array<i64: 1, 8, 32>}]} {
    %c0_i32 = arith.constant 0 : i32
    %0 = arith.cmpi eq, %arg2, %c0_i32 : i32
    %1 = arith.extui %0 : i1 to i32
    %c0_i32_0 = arith.constant 0 : i32
    %2 = arith.cmpi ne, %1, %c0_i32_0 : i32
    scf.if %2 {
      %cst_97 = arith.constant -1.000000e+30 : f32
      %161 = vector.broadcast %cst_97 : f32 to vector<4x8x1xf32>
      %c0_98 = arith.constant 0 : index
      %c0_99 = arith.constant 0 : index
      %c0_100 = arith.constant 0 : index
      %162 = vector.load %arg8[%c0_98, %c0_99, %c0_100] : memref<4x8x1xf32, #tpu.memory_space<vmem>>, vector<4x8x1xf32>
      tpu.vector_store %arg8[%c0_98, %c0_99, %c0_100], %161 {strides = array<i32>} : memref<4x8x1xf32, #tpu.memory_space<vmem>>, vector<4x8x1xf32>,
      %cst_101 = arith.constant 0.000000e+00 : f32
      %163 = vector.broadcast %cst_101 : f32 to vector<4x8x1xf32>
      %c0_102 = arith.constant 0 : index
      %c0_103 = arith.constant 0 : index
      %c0_104 = arith.constant 0 : index
      %164 = vector.load %arg9[%c0_102, %c0_103, %c0_104] : memref<4x8x1xf32, #tpu.memory_space<vmem>>, vector<4x8x1xf32>
      tpu.vector_store %arg9[%c0_102, %c0_103, %c0_104], %163 {strides = array<i32>} : memref<4x8x1xf32, #tpu.memory_space<vmem>>, vector<4x8x1xf32>,
      %cst_105 = arith.constant 0.000000e+00 : f32
      %165 = vector.broadcast %cst_105 : f32 to vector<4x8x8xf32>
      %c0_106 = arith.constant 0 : index
      %c0_107 = arith.constant 0 : index
      %c0_108 = arith.constant 0 : index
      %166 = vector.load %arg10[%c0_106, %c0_107, %c0_108] : memref<4x8x8xf32, #tpu.memory_space<vmem>>, vector<4x8x8xf32>
      tpu.vector_store %arg10[%c0_106, %c0_107, %c0_108], %165 {strides = array<i32>} : memref<4x8x8xf32, #tpu.memory_space<vmem>>, vector<4x8x8xf32>,
    } else {
    }
    %c0 = arith.constant 0 : index
    %c0_1 = arith.constant 0 : index
    %c0_2 = arith.constant 0 : index
    %3 = vector.load %arg3[%c0, %c0_1, %c0_2] : memref<1x8x32xbf16, #tpu.memory_space<vmem>>, vector<1x8x32xbf16>
    %4 = vector.shape_cast %3 : vector<1x8x32xbf16> to vector<8x32xbf16>
    %c0_3 = arith.constant 0 : index
    %c0_4 = arith.constant 0 : index
    %c0_5 = arith.constant 0 : index
    %5 = vector.load %arg4[%c0_3, %c0_4, %c0_5] : memref<1x8x32xbf16, #tpu.memory_space<vmem>>, vector<1x8x32xbf16>
    %6 = vector.shape_cast %5 : vector<1x8x32xbf16> to vector<8x32xbf16>
    %c0_6 = arith.constant 0 : index
    %c0_7 = arith.constant 0 : index
    %c0_8 = arith.constant 0 : index
    %7 = vector.load %arg5[%c0_6, %c0_7, %c0_8] : memref<1x8x32xbf16, #tpu.memory_space<vmem>>, vector<1x8x32xbf16>
    %8 = vector.shape_cast %7 : vector<1x8x32xbf16> to vector<8x32xbf16>
    %c0_9 = arith.constant 0 : index
    %c0_10 = arith.constant 0 : index
    %9 = vector.load %arg6[%c0_9, %c0_10] : memref<8x8xf32, #tpu.memory_space<vmem>>, vector<8x8xf32>
    %10 = vector.extract_strided_slice %4 {offsets = [0, 0], sizes = [8, 8], strides = [1, 1]} : vector<8x32xbf16> to vector<8x8xbf16>
    %11 = vector.extract_strided_slice %6 {offsets = [0, 0], sizes = [8, 8], strides = [1, 1]} : vector<8x32xbf16> to vector<8x8xbf16>
    %cst = arith.constant dense<0.000000e+00> : vector<8x8xf32>
    %12 = tpu.matmul %10, %11, %cst {dimension_numbers = #tpu.dot_dimension_numbers<[1], [1], [0], [0], [0, 0, 1, 0], [], []>} : vector<8x8xbf16>, vector<8x8xbf16>, vector<8x8xf32> -> vector<8x8xf32>
    %13 = arith.addf %12, %9 : vector<8x8xf32>
    %c0_11 = arith.constant 0 : index
    %c0_12 = arith.constant 0 : index
    %c0_13 = arith.constant 0 : index
    %14 = vector.load %arg8[%c0_11, %c0_12, %c0_13] : memref<4x8x1xf32, #tpu.memory_space<vmem>>, vector<1x8x1xf32>
    %15 = vector.shape_cast %14 : vector<1x8x1xf32> to vector<8x1xf32>
    %cst_14 = arith.constant dense<0xFF800000> : vector<8xf32>
    %16 = vector.multi_reduction <maximumf>, %13, %cst_14 [1] : vector<8x8xf32> to vector<8xf32>
    %17 = vector.shape_cast %16 : vector<8xf32> to vector<8x1xf32>
    %18 = arith.maximumf %15, %17 : vector<8x1xf32>
    %19 = arith.subf %15, %18 : vector<8x1xf32>
    %20 = math.exp %19 : vector<8x1xf32>
    %21 = vector.broadcast %18 : vector<8x1xf32> to vector<8x8xf32>
    %22 = arith.subf %13, %21 : vector<8x8xf32>
    %23 = math.exp %22 : vector<8x8xf32>
    %c0_15 = arith.constant 0 : index
    %c0_16 = arith.constant 0 : index
    %c0_17 = arith.constant 0 : index
    %24 = vector.load %arg9[%c0_15, %c0_16, %c0_17] : memref<4x8x1xf32, #tpu.memory_space<vmem>>, vector<1x8x1xf32>
    %25 = vector.shape_cast %24 : vector<1x8x1xf32> to vector<8x1xf32>
    %26 = arith.mulf %20, %25 : vector<8x1xf32>
    %cst_18 = arith.constant dense<0.000000e+00> : vector<8xf32>
    %27 = vector.multi_reduction <add>, %23, %cst_18 [1] : vector<8x8xf32> to vector<8xf32>
    %28 = vector.shape_cast %27 : vector<8xf32> to vector<8x1xf32>
    %29 = arith.addf %26, %28 : vector<8x1xf32>
    %c0_19 = arith.constant 0 : index
    %c0_20 = arith.constant 0 : index
    %c0_21 = arith.constant 0 : index
    %30 = vector.load %arg9[%c0_19, %c0_20, %c0_21] : memref<4x8x1xf32, #tpu.memory_space<vmem>>, vector<1x8x1xf32>
    %31 = vector.shape_cast %30 : vector<1x8x1xf32> to vector<8x1xf32>
    %32 = vector.shape_cast %29 : vector<8x1xf32> to vector<1x8x1xf32>
    tpu.vector_store %arg9[%c0_19, %c0_20, %c0_21], %32 {strides = array<i32>} : memref<4x8x1xf32, #tpu.memory_space<vmem>>, vector<1x8x1xf32>,
    %33 = arith.truncf %23 : vector<8x8xf32> to vector<8x8xbf16>
    %34 = vector.extract_strided_slice %8 {offsets = [0, 0], sizes = [8, 8], strides = [1, 1]} : vector<8x32xbf16> to vector<8x8xbf16>
    %cst_22 = arith.constant dense<0.000000e+00> : vector<8x8xf32>
    %35 = tpu.matmul %33, %34, %cst_22 {dimension_numbers = #tpu.dot_dimension_numbers<[1], [0], [0], [1], [0, 0, 1, 1], [], []>} : vector<8x8xbf16>, vector<8x8xbf16>, vector<8x8xf32> -> vector<8x8xf32>
    %c0_23 = arith.constant 0 : index
    %c0_24 = arith.constant 0 : index
    %c0_25 = arith.constant 0 : index
    %36 = vector.load %arg10[%c0_23, %c0_24, %c0_25] : memref<4x8x8xf32, #tpu.memory_space<vmem>>, vector<1x8x8xf32>
    %37 = vector.shape_cast %36 : vector<1x8x8xf32> to vector<8x8xf32>
    %38 = vector.broadcast %20 : vector<8x1xf32> to vector<8x8xf32>
    %39 = arith.mulf %38, %37 : vector<8x8xf32>
    %40 = arith.addf %39, %35 : vector<8x8xf32>
    %c0_26 = arith.constant 0 : index
    %c0_27 = arith.constant 0 : index
    %c0_28 = arith.constant 0 : index
    %41 = vector.load %arg10[%c0_26, %c0_27, %c0_28] : memref<4x8x8xf32, #tpu.memory_space<vmem>>, vector<1x8x8xf32>
    %42 = vector.shape_cast %41 : vector<1x8x8xf32> to vector<8x8xf32>
    %43 = vector.shape_cast %40 : vector<8x8xf32> to vector<1x8x8xf32>
    tpu.vector_store %arg10[%c0_26, %c0_27, %c0_28], %43 {strides = array<i32>} : memref<4x8x8xf32, #tpu.memory_space<vmem>>, vector<1x8x8xf32>,
    %c0_29 = arith.constant 0 : index
    %c0_30 = arith.constant 0 : index
    %c0_31 = arith.constant 0 : index
    %44 = vector.load %arg8[%c0_29, %c0_30, %c0_31] : memref<4x8x1xf32, #tpu.memory_space<vmem>>, vector<1x8x1xf32>
    %45 = vector.shape_cast %44 : vector<1x8x1xf32> to vector<8x1xf32>
    %46 = vector.shape_cast %18 : vector<8x1xf32> to vector<1x8x1xf32>
    tpu.vector_store %arg8[%c0_29, %c0_30, %c0_31], %46 {strides = array<i32>} : memref<4x8x1xf32, #tpu.memory_space<vmem>>, vector<1x8x1xf32>,
    %47 = vector.extract_strided_slice %4 {offsets = [0, 8], sizes = [8, 8], strides = [1, 1]} : vector<8x32xbf16> to vector<8x8xbf16>
    %48 = vector.extract_strided_slice %6 {offsets = [0, 8], sizes = [8, 8], strides = [1, 1]} : vector<8x32xbf16> to vector<8x8xbf16>
    %cst_32 = arith.constant dense<0.000000e+00> : vector<8x8xf32>
    %49 = tpu.matmul %47, %48, %cst_32 {dimension_numbers = #tpu.dot_dimension_numbers<[1], [1], [0], [0], [0, 0, 1, 0], [], []>} : vector<8x8xbf16>, vector<8x8xbf16>, vector<8x8xf32> -> vector<8x8xf32>
    %50 = arith.addf %49, %9 : vector<8x8xf32>
    %c1 = arith.constant 1 : index
    %c0_33 = arith.constant 0 : index
    %c0_34 = arith.constant 0 : index
    %51 = vector.load %arg8[%c1, %c0_33, %c0_34] : memref<4x8x1xf32, #tpu.memory_space<vmem>>, vector<1x8x1xf32>
    %52 = vector.shape_cast %51 : vector<1x8x1xf32> to vector<8x1xf32>
    %cst_35 = arith.constant dense<0xFF800000> : vector<8xf32>
    %53 = vector.multi_reduction <maximumf>, %50, %cst_35 [1] : vector<8x8xf32> to vector<8xf32>
    %54 = vector.shape_cast %53 : vector<8xf32> to vector<8x1xf32>
    %55 = arith.maximumf %52, %54 : vector<8x1xf32>
    %56 = arith.subf %52, %55 : vector<8x1xf32>
    %57 = math.exp %56 : vector<8x1xf32>
    %58 = vector.broadcast %55 : vector<8x1xf32> to vector<8x8xf32>
    %59 = arith.subf %50, %58 : vector<8x8xf32>
    %60 = math.exp %59 : vector<8x8xf32>
    %c1_36 = arith.constant 1 : index
    %c0_37 = arith.constant 0 : index
    %c0_38 = arith.constant 0 : index
    %61 = vector.load %arg9[%c1_36, %c0_37, %c0_38] : memref<4x8x1xf32, #tpu.memory_space<vmem>>, vector<1x8x1xf32>
    %62 = vector.shape_cast %61 : vector<1x8x1xf32> to vector<8x1xf32>
    %63 = arith.mulf %57, %62 : vector<8x1xf32>
    %cst_39 = arith.constant dense<0.000000e+00> : vector<8xf32>
    %64 = vector.multi_reduction <add>, %60, %cst_39 [1] : vector<8x8xf32> to vector<8xf32>
    %65 = vector.shape_cast %64 : vector<8xf32> to vector<8x1xf32>
    %66 = arith.addf %63, %65 : vector<8x1xf32>
    %c1_40 = arith.constant 1 : index
    %c0_41 = arith.constant 0 : index
    %c0_42 = arith.constant 0 : index
    %67 = vector.load %arg9[%c1_40, %c0_41, %c0_42] : memref<4x8x1xf32, #tpu.memory_space<vmem>>, vector<1x8x1xf32>
    %68 = vector.shape_cast %67 : vector<1x8x1xf32> to vector<8x1xf32>
    %69 = vector.shape_cast %66 : vector<8x1xf32> to vector<1x8x1xf32>
    tpu.vector_store %arg9[%c1_40, %c0_41, %c0_42], %69 {strides = array<i32>} : memref<4x8x1xf32, #tpu.memory_space<vmem>>, vector<1x8x1xf32>,
    %70 = arith.truncf %60 : vector<8x8xf32> to vector<8x8xbf16>
    %71 = vector.extract_strided_slice %8 {offsets = [0, 8], sizes = [8, 8], strides = [1, 1]} : vector<8x32xbf16> to vector<8x8xbf16>
    %cst_43 = arith.constant dense<0.000000e+00> : vector<8x8xf32>
    %72 = tpu.matmul %70, %71, %cst_43 {dimension_numbers = #tpu.dot_dimension_numbers<[1], [0], [0], [1], [0, 0, 1, 1], [], []>} : vector<8x8xbf16>, vector<8x8xbf16>, vector<8x8xf32> -> vector<8x8xf32>
    %c1_44 = arith.constant 1 : index
    %c0_45 = arith.constant 0 : index
    %c0_46 = arith.constant 0 : index
    %73 = vector.load %arg10[%c1_44, %c0_45, %c0_46] : memref<4x8x8xf32, #tpu.memory_space<vmem>>, vector<1x8x8xf32>
    %74 = vector.shape_cast %73 : vector<1x8x8xf32> to vector<8x8xf32>
    %75 = vector.broadcast %57 : vector<8x1xf32> to vector<8x8xf32>
    %76 = arith.mulf %75, %74 : vector<8x8xf32>
    %77 = arith.addf %76, %72 : vector<8x8xf32>
    %c1_47 = arith.constant 1 : index
    %c0_48 = arith.constant 0 : index
    %c0_49 = arith.constant 0 : index
    %78 = vector.load %arg10[%c1_47, %c0_48, %c0_49] : memref<4x8x8xf32, #tpu.memory_space<vmem>>, vector<1x8x8xf32>
    %79 = vector.shape_cast %78 : vector<1x8x8xf32> to vector<8x8xf32>
    %80 = vector.shape_cast %77 : vector<8x8xf32> to vector<1x8x8xf32>
    tpu.vector_store %arg10[%c1_47, %c0_48, %c0_49], %80 {strides = array<i32>} : memref<4x8x8xf32, #tpu.memory_space<vmem>>, vector<1x8x8xf32>,
    %c1_50 = arith.constant 1 : index
    %c0_51 = arith.constant 0 : index
    %c0_52 = arith.constant 0 : index
    %81 = vector.load %arg8[%c1_50, %c0_51, %c0_52] : memref<4x8x1xf32, #tpu.memory_space<vmem>>, vector<1x8x1xf32>
    %82 = vector.shape_cast %81 : vector<1x8x1xf32> to vector<8x1xf32>
    %83 = vector.shape_cast %55 : vector<8x1xf32> to vector<1x8x1xf32>
    tpu.vector_store %arg8[%c1_50, %c0_51, %c0_52], %83 {strides = array<i32>} : memref<4x8x1xf32, #tpu.memory_space<vmem>>, vector<1x8x1xf32>,
    %84 = vector.extract_strided_slice %4 {offsets = [0, 16], sizes = [8, 8], strides = [1, 1]} : vector<8x32xbf16> to vector<8x8xbf16>
    %85 = vector.extract_strided_slice %6 {offsets = [0, 16], sizes = [8, 8], strides = [1, 1]} : vector<8x32xbf16> to vector<8x8xbf16>
    %cst_53 = arith.constant dense<0.000000e+00> : vector<8x8xf32>
    %86 = tpu.matmul %84, %85, %cst_53 {dimension_numbers = #tpu.dot_dimension_numbers<[1], [1], [0], [0], [0, 0, 1, 0], [], []>} : vector<8x8xbf16>, vector<8x8xbf16>, vector<8x8xf32> -> vector<8x8xf32>
    %87 = arith.addf %86, %9 : vector<8x8xf32>
    %c2 = arith.constant 2 : index
    %c0_54 = arith.constant 0 : index
    %c0_55 = arith.constant 0 : index
    %88 = vector.load %arg8[%c2, %c0_54, %c0_55] : memref<4x8x1xf32, #tpu.memory_space<vmem>>, vector<1x8x1xf32>
    %89 = vector.shape_cast %88 : vector<1x8x1xf32> to vector<8x1xf32>
    %cst_56 = arith.constant dense<0xFF800000> : vector<8xf32>
    %90 = vector.multi_reduction <maximumf>, %87, %cst_56 [1] : vector<8x8xf32> to vector<8xf32>
    %91 = vector.shape_cast %90 : vector<8xf32> to vector<8x1xf32>
    %92 = arith.maximumf %89, %91 : vector<8x1xf32>
    %93 = arith.subf %89, %92 : vector<8x1xf32>
    %94 = math.exp %93 : vector<8x1xf32>
    %95 = vector.broadcast %92 : vector<8x1xf32> to vector<8x8xf32>
    %96 = arith.subf %87, %95 : vector<8x8xf32>
    %97 = math.exp %96 : vector<8x8xf32>
    %c2_57 = arith.constant 2 : index
    %c0_58 = arith.constant 0 : index
    %c0_59 = arith.constant 0 : index
    %98 = vector.load %arg9[%c2_57, %c0_58, %c0_59] : memref<4x8x1xf32, #tpu.memory_space<vmem>>, vector<1x8x1xf32>
    %99 = vector.shape_cast %98 : vector<1x8x1xf32> to vector<8x1xf32>
    %100 = arith.mulf %94, %99 : vector<8x1xf32>
    %cst_60 = arith.constant dense<0.000000e+00> : vector<8xf32>
    %101 = vector.multi_reduction <add>, %97, %cst_60 [1] : vector<8x8xf32> to vector<8xf32>
    %102 = vector.shape_cast %101 : vector<8xf32> to vector<8x1xf32>
    %103 = arith.addf %100, %102 : vector<8x1xf32>
    %c2_61 = arith.constant 2 : index
    %c0_62 = arith.constant 0 : index
    %c0_63 = arith.constant 0 : index
    %104 = vector.load %arg9[%c2_61, %c0_62, %c0_63] : memref<4x8x1xf32, #tpu.memory_space<vmem>>, vector<1x8x1xf32>
    %105 = vector.shape_cast %104 : vector<1x8x1xf32> to vector<8x1xf32>
    %106 = vector.shape_cast %103 : vector<8x1xf32> to vector<1x8x1xf32>
    tpu.vector_store %arg9[%c2_61, %c0_62, %c0_63], %106 {strides = array<i32>} : memref<4x8x1xf32, #tpu.memory_space<vmem>>, vector<1x8x1xf32>,
    %107 = arith.truncf %97 : vector<8x8xf32> to vector<8x8xbf16>
    %108 = vector.extract_strided_slice %8 {offsets = [0, 16], sizes = [8, 8], strides = [1, 1]} : vector<8x32xbf16> to vector<8x8xbf16>
    %cst_64 = arith.constant dense<0.000000e+00> : vector<8x8xf32>
    %109 = tpu.matmul %107, %108, %cst_64 {dimension_numbers = #tpu.dot_dimension_numbers<[1], [0], [0], [1], [0, 0, 1, 1], [], []>} : vector<8x8xbf16>, vector<8x8xbf16>, vector<8x8xf32> -> vector<8x8xf32>
    %c2_65 = arith.constant 2 : index
    %c0_66 = arith.constant 0 : index
    %c0_67 = arith.constant 0 : index
    %110 = vector.load %arg10[%c2_65, %c0_66, %c0_67] : memref<4x8x8xf32, #tpu.memory_space<vmem>>, vector<1x8x8xf32>
    %111 = vector.shape_cast %110 : vector<1x8x8xf32> to vector<8x8xf32>
    %112 = vector.broadcast %94 : vector<8x1xf32> to vector<8x8xf32>
    %113 = arith.mulf %112, %111 : vector<8x8xf32>
    %114 = arith.addf %113, %109 : vector<8x8xf32>
    %c2_68 = arith.constant 2 : index
    %c0_69 = arith.constant 0 : index
    %c0_70 = arith.constant 0 : index
    %115 = vector.load %arg10[%c2_68, %c0_69, %c0_70] : memref<4x8x8xf32, #tpu.memory_space<vmem>>, vector<1x8x8xf32>
    %116 = vector.shape_cast %115 : vector<1x8x8xf32> to vector<8x8xf32>
    %117 = vector.shape_cast %114 : vector<8x8xf32> to vector<1x8x8xf32>
    tpu.vector_store %arg10[%c2_68, %c0_69, %c0_70], %117 {strides = array<i32>} : memref<4x8x8xf32, #tpu.memory_space<vmem>>, vector<1x8x8xf32>,
    %c2_71 = arith.constant 2 : index
    %c0_72 = arith.constant 0 : index
    %c0_73 = arith.constant 0 : index
    %118 = vector.load %arg8[%c2_71, %c0_72, %c0_73] : memref<4x8x1xf32, #tpu.memory_space<vmem>>, vector<1x8x1xf32>
    %119 = vector.shape_cast %118 : vector<1x8x1xf32> to vector<8x1xf32>
    %120 = vector.shape_cast %92 : vector<8x1xf32> to vector<1x8x1xf32>
    tpu.vector_store %arg8[%c2_71, %c0_72, %c0_73], %120 {strides = array<i32>} : memref<4x8x1xf32, #tpu.memory_space<vmem>>, vector<1x8x1xf32>,
    %121 = vector.extract_strided_slice %4 {offsets = [0, 24], sizes = [8, 8], strides = [1, 1]} : vector<8x32xbf16> to vector<8x8xbf16>
    %122 = vector.extract_strided_slice %6 {offsets = [0, 24], sizes = [8, 8], strides = [1, 1]} : vector<8x32xbf16> to vector<8x8xbf16>
    %cst_74 = arith.constant dense<0.000000e+00> : vector<8x8xf32>
    %123 = tpu.matmul %121, %122, %cst_74 {dimension_numbers = #tpu.dot_dimension_numbers<[1], [1], [0], [0], [0, 0, 1, 0], [], []>} : vector<8x8xbf16>, vector<8x8xbf16>, vector<8x8xf32> -> vector<8x8xf32>
    %124 = arith.addf %123, %9 : vector<8x8xf32>
    %c3 = arith.constant 3 : index
    %c0_75 = arith.constant 0 : index
    %c0_76 = arith.constant 0 : index
    %125 = vector.load %arg8[%c3, %c0_75, %c0_76] : memref<4x8x1xf32, #tpu.memory_space<vmem>>, vector<1x8x1xf32>
    %126 = vector.shape_cast %125 : vector<1x8x1xf32> to vector<8x1xf32>
    %cst_77 = arith.constant dense<0xFF800000> : vector<8xf32>
    %127 = vector.multi_reduction <maximumf>, %124, %cst_77 [1] : vector<8x8xf32> to vector<8xf32>
    %128 = vector.shape_cast %127 : vector<8xf32> to vector<8x1xf32>
    %129 = arith.maximumf %126, %128 : vector<8x1xf32>
    %130 = arith.subf %126, %129 : vector<8x1xf32>
    %131 = math.exp %130 : vector<8x1xf32>
    %132 = vector.broadcast %129 : vector<8x1xf32> to vector<8x8xf32>
    %133 = arith.subf %124, %132 : vector<8x8xf32>
    %134 = math.exp %133 : vector<8x8xf32>
    %c3_78 = arith.constant 3 : index
    %c0_79 = arith.constant 0 : index
    %c0_80 = arith.constant 0 : index
    %135 = vector.load %arg9[%c3_78, %c0_79, %c0_80] : memref<4x8x1xf32, #tpu.memory_space<vmem>>, vector<1x8x1xf32>
    %136 = vector.shape_cast %135 : vector<1x8x1xf32> to vector<8x1xf32>
    %137 = arith.mulf %131, %136 : vector<8x1xf32>
    %cst_81 = arith.constant dense<0.000000e+00> : vector<8xf32>
    %138 = vector.multi_reduction <add>, %134, %cst_81 [1] : vector<8x8xf32> to vector<8xf32>
    %139 = vector.shape_cast %138 : vector<8xf32> to vector<8x1xf32>
    %140 = arith.addf %137, %139 : vector<8x1xf32>
    %c3_82 = arith.constant 3 : index
    %c0_83 = arith.constant 0 : index
    %c0_84 = arith.constant 0 : index
    %141 = vector.load %arg9[%c3_82, %c0_83, %c0_84] : memref<4x8x1xf32, #tpu.memory_space<vmem>>, vector<1x8x1xf32>
    %142 = vector.shape_cast %141 : vector<1x8x1xf32> to vector<8x1xf32>
    %143 = vector.shape_cast %140 : vector<8x1xf32> to vector<1x8x1xf32>
    tpu.vector_store %arg9[%c3_82, %c0_83, %c0_84], %143 {strides = array<i32>} : memref<4x8x1xf32, #tpu.memory_space<vmem>>, vector<1x8x1xf32>,
    %144 = arith.truncf %134 : vector<8x8xf32> to vector<8x8xbf16>
    %145 = vector.extract_strided_slice %8 {offsets = [0, 24], sizes = [8, 8], strides = [1, 1]} : vector<8x32xbf16> to vector<8x8xbf16>
    %cst_85 = arith.constant dense<0.000000e+00> : vector<8x8xf32>
    %146 = tpu.matmul %144, %145, %cst_85 {dimension_numbers = #tpu.dot_dimension_numbers<[1], [0], [0], [1], [0, 0, 1, 1], [], []>} : vector<8x8xbf16>, vector<8x8xbf16>, vector<8x8xf32> -> vector<8x8xf32>
    %c3_86 = arith.constant 3 : index
    %c0_87 = arith.constant 0 : index
    %c0_88 = arith.constant 0 : index
    %147 = vector.load %arg10[%c3_86, %c0_87, %c0_88] : memref<4x8x8xf32, #tpu.memory_space<vmem>>, vector<1x8x8xf32>
    %148 = vector.shape_cast %147 : vector<1x8x8xf32> to vector<8x8xf32>
    %149 = vector.broadcast %131 : vector<8x1xf32> to vector<8x8xf32>
    %150 = arith.mulf %149, %148 : vector<8x8xf32>
    %151 = arith.addf %150, %146 : vector<8x8xf32>
    %c3_89 = arith.constant 3 : index
    %c0_90 = arith.constant 0 : index
    %c0_91 = arith.constant 0 : index
    %152 = vector.load %arg10[%c3_89, %c0_90, %c0_91] : memref<4x8x8xf32, #tpu.memory_space<vmem>>, vector<1x8x8xf32>
    %153 = vector.shape_cast %152 : vector<1x8x8xf32> to vector<8x8xf32>
    %154 = vector.shape_cast %151 : vector<8x8xf32> to vector<1x8x8xf32>
    tpu.vector_store %arg10[%c3_89, %c0_90, %c0_91], %154 {strides = array<i32>} : memref<4x8x8xf32, #tpu.memory_space<vmem>>, vector<1x8x8xf32>,
    %c3_92 = arith.constant 3 : index
    %c0_93 = arith.constant 0 : index
    %c0_94 = arith.constant 0 : index
    %155 = vector.load %arg8[%c3_92, %c0_93, %c0_94] : memref<4x8x1xf32, #tpu.memory_space<vmem>>, vector<1x8x1xf32>
    %156 = vector.shape_cast %155 : vector<1x8x1xf32> to vector<8x1xf32>
    %157 = vector.shape_cast %129 : vector<8x1xf32> to vector<1x8x1xf32>
    tpu.vector_store %arg8[%c3_92, %c0_93, %c0_94], %157 {strides = array<i32>} : memref<4x8x1xf32, #tpu.memory_space<vmem>>, vector<1x8x1xf32>,
    %c0_i32_95 = arith.constant 0 : i32
    %158 = arith.cmpi eq, %arg2, %c0_i32_95 : i32
    %159 = arith.extui %158 : i1 to i32
    %c0_i32_96 = arith.constant 0 : i32
    %160 = arith.cmpi ne, %159, %c0_i32_96 : i32
    scf.if %160 {
      %c0_97 = arith.constant 0 : index
      %c0_98 = arith.constant 0 : index
      %c0_99 = arith.constant 0 : index
      %161 = vector.load %arg10[%c0_97, %c0_98, %c0_99] : memref<4x8x8xf32, #tpu.memory_space<vmem>>, vector<1x8x8xf32>
      %162 = vector.shape_cast %161 : vector<1x8x8xf32> to vector<8x8xf32>
      %c0_100 = arith.constant 0 : index
      %c0_101 = arith.constant 0 : index
      %c0_102 = arith.constant 0 : index
      %163 = vector.load %arg9[%c0_100, %c0_101, %c0_102] : memref<4x8x1xf32, #tpu.memory_space<vmem>>, vector<1x8x1xf32>
      %164 = vector.shape_cast %163 : vector<1x8x1xf32> to vector<8x1xf32>
      %165 = tpu.reciprocal %164 {approx = true} : vector<8x1xf32> -> vector<8x1xf32>
      %166 = vector.broadcast %165 : vector<8x1xf32> to vector<8x8xf32>
      %167 = arith.mulf %162, %166 : vector<8x8xf32>
      %c1_103 = arith.constant 1 : index
      %c0_104 = arith.constant 0 : index
      %c0_105 = arith.constant 0 : index
      %168 = vector.load %arg10[%c1_103, %c0_104, %c0_105] : memref<4x8x8xf32, #tpu.memory_space<vmem>>, vector<1x8x8xf32>
      %169 = vector.shape_cast %168 : vector<1x8x8xf32> to vector<8x8xf32>
      %c1_106 = arith.constant 1 : index
      %c0_107 = arith.constant 0 : index
      %c0_108 = arith.constant 0 : index
      %170 = vector.load %arg9[%c1_106, %c0_107, %c0_108] : memref<4x8x1xf32, #tpu.memory_space<vmem>>, vector<1x8x1xf32>
      %171 = vector.shape_cast %170 : vector<1x8x1xf32> to vector<8x1xf32>
      %172 = tpu.reciprocal %171 {approx = true} : vector<8x1xf32> -> vector<8x1xf32>
      %173 = vector.broadcast %172 : vector<8x1xf32> to vector<8x8xf32>
      %174 = arith.mulf %169, %173 : vector<8x8xf32>
      %c2_109 = arith.constant 2 : index
      %c0_110 = arith.constant 0 : index
      %c0_111 = arith.constant 0 : index
      %175 = vector.load %arg10[%c2_109, %c0_110, %c0_111] : memref<4x8x8xf32, #tpu.memory_space<vmem>>, vector<1x8x8xf32>
      %176 = vector.shape_cast %175 : vector<1x8x8xf32> to vector<8x8xf32>
      %c2_112 = arith.constant 2 : index
      %c0_113 = arith.constant 0 : index
      %c0_114 = arith.constant 0 : index
      %177 = vector.load %arg9[%c2_112, %c0_113, %c0_114] : memref<4x8x1xf32, #tpu.memory_space<vmem>>, vector<1x8x1xf32>
      %178 = vector.shape_cast %177 : vector<1x8x1xf32> to vector<8x1xf32>
      %179 = tpu.reciprocal %178 {approx = true} : vector<8x1xf32> -> vector<8x1xf32>
      %180 = vector.broadcast %179 : vector<8x1xf32> to vector<8x8xf32>
      %181 = arith.mulf %176, %180 : vector<8x8xf32>
      %c3_115 = arith.constant 3 : index
      %c0_116 = arith.constant 0 : index
      %c0_117 = arith.constant 0 : index
      %182 = vector.load %arg10[%c3_115, %c0_116, %c0_117] : memref<4x8x8xf32, #tpu.memory_space<vmem>>, vector<1x8x8xf32>
      %183 = vector.shape_cast %182 : vector<1x8x8xf32> to vector<8x8xf32>
      %c3_118 = arith.constant 3 : index
      %c0_119 = arith.constant 0 : index
      %c0_120 = arith.constant 0 : index
      %184 = vector.load %arg9[%c3_118, %c0_119, %c0_120] : memref<4x8x1xf32, #tpu.memory_space<vmem>>, vector<1x8x1xf32>
      %185 = vector.shape_cast %184 : vector<1x8x1xf32> to vector<8x1xf32>
      %186 = tpu.reciprocal %185 {approx = true} : vector<8x1xf32> -> vector<8x1xf32>
      %187 = vector.broadcast %186 : vector<8x1xf32> to vector<8x8xf32>
      %188 = arith.mulf %183, %187 : vector<8x8xf32>
      %189 = tpu.concatenate %167, %174, %181, %188 in 1 : vector<8x8xf32>, vector<8x8xf32>, vector<8x8xf32>, vector<8x8xf32> -> vector<8x32xf32>
      %190 = arith.truncf %189 : vector<8x32xf32> to vector<8x32xbf16>
      %c0_121 = arith.constant 0 : index
      %c0_122 = arith.constant 0 : index
      %c0_123 = arith.constant 0 : index
      %191 = vector.load %arg7[%c0_121, %c0_122, %c0_123] : memref<1x8x32xbf16, #tpu.memory_space<vmem>>, vector<1x8x32xbf16>
      %192 = vector.shape_cast %191 : vector<1x8x32xbf16> to vector<8x32xbf16>
      %193 = vector.shape_cast %190 : vector<8x32xbf16> to vector<1x8x32xbf16>
      tpu.vector_store %arg7[%c0_121, %c0_122, %c0_123], %193 {strides = array<i32>} : memref<1x8x32xbf16, #tpu.memory_space<vmem>>, vector<1x8x32xbf16>,
    } else {
    }
    return
  }
  func.func @transform_0(%arg0: i32, %arg1: i32, %arg2: i32) -> (i32, i32, i32) {
    %c0_i32 = arith.constant 0 : i32
    %c0_i32_0 = arith.constant 0 : i32
    return %arg0, %arg1, %c0_i32 : i32, i32, i32
  }
  func.func @transform_1(%arg0: i32, %arg1: i32, %arg2: i32) -> (i32, i32, i32) {
    %c0_i32 = arith.constant 0 : i32
    %c0_i32_0 = arith.constant 0 : i32
    return %arg0, %arg2, %c0_i32 : i32, i32, i32
  }
  func.func @transform_2(%arg0: i32, %arg1: i32, %arg2: i32) -> (i32, i32, i32) {
    %c0_i32 = arith.constant 0 : i32
    %c0_i32_0 = arith.constant 0 : i32
    return %arg0, %arg2, %c0_i32 : i32, i32, i32
  }
  func.func @transform_3(%arg0: i32, %arg1: i32, %arg2: i32) -> (i32, i32) {
    %c0_i32 = arith.constant 0 : i32
    return %arg1, %arg2 : i32, i32
  }
  func.func @transform_4(%arg0: i32, %arg1: i32, %arg2: i32) -> (i32, i32, i32) {
    %c0_i32 = arith.constant 0 : i32
    %c0_i32_0 = arith.constant 0 : i32
    return %arg0, %arg1, %c0_i32 : i32, i32, i32
  }
}

module attributes {stable_mosaic.version = 11 : i64} {
  func.func @_ffn_res_ln_kernel(%arg0: i32, %arg1: memref<8x32xf32, #tpu.memory_space<vmem>>, %arg2: memref<64x32xbf16, #tpu.memory_space<vmem>>, %arg3: memref<1x64xf32, #tpu.memory_space<vmem>>, %arg4: memref<32x64xbf16, #tpu.memory_space<vmem>>, %arg5: memref<1x32xf32, #tpu.memory_space<vmem>>, %arg6: memref<1x32xf32, #tpu.memory_space<vmem>>, %arg7: memref<1x32xf32, #tpu.memory_space<vmem>>, %arg8: memref<8x32xf32, #tpu.memory_space<vmem>>) attributes {dimension_semantics = [#tpu.dimension_semantics<parallel>], iteration_bounds = array<i64: 2>, scalar_prefetch = 0 : i64, scratch_operands = 0 : i64, tpu.core_type = #tpu.core_type<tc>, window_params = [{transform_indices = @transform_0, window_bounds = array<i64: 8, 32>}, {pipeline_mode = #tpu.pipeline_mode<synchronous>, transform_indices = @transform_1, window_bounds = array<i64: 64, 32>}, {pipeline_mode = #tpu.pipeline_mode<synchronous>, transform_indices = @transform_2, window_bounds = array<i64: 1, 64>}, {pipeline_mode = #tpu.pipeline_mode<synchronous>, transform_indices = @transform_3, window_bounds = array<i64: 32, 64>}, {pipeline_mode = #tpu.pipeline_mode<synchronous>, transform_indices = @transform_4, window_bounds = array<i64: 1, 32>}, {pipeline_mode = #tpu.pipeline_mode<synchronous>, transform_indices = @transform_5, window_bounds = array<i64: 1, 32>}, {pipeline_mode = #tpu.pipeline_mode<synchronous>, transform_indices = @transform_6, window_bounds = array<i64: 1, 32>}, {transform_indices = @transform_7, window_bounds = array<i64: 8, 32>}]} {
    %c0 = arith.constant 0 : index
    %c0_0 = arith.constant 0 : index
    %0 = vector.load %arg1[%c0, %c0_0] : memref<8x32xf32, #tpu.memory_space<vmem>>, vector<8x32xf32>
    %c0_1 = arith.constant 0 : index
    %c0_2 = arith.constant 0 : index
    %1 = vector.load %arg2[%c0_1, %c0_2] : memref<64x32xbf16, #tpu.memory_space<vmem>>, vector<64x32xbf16>
    %2 = arith.truncf %0 : vector<8x32xf32> to vector<8x32xbf16>
    %cst = arith.constant dense<0.000000e+00> : vector<8x64xf32>
    %3 = tpu.matmul %2, %1, %cst {dimension_numbers = #tpu.dot_dimension_numbers<[1], [1], [0], [0], [0, 0, 1, 0], [], []>} : vector<8x32xbf16>, vector<64x32xbf16>, vector<8x64xf32> -> vector<8x64xf32>
    %c0_3 = arith.constant 0 : index
    %c0_4 = arith.constant 0 : index
    %4 = vector.load %arg3[%c0_3, %c0_4] : memref<1x64xf32, #tpu.memory_space<vmem>>, vector<1x64xf32>
    %5 = vector.broadcast %4 : vector<1x64xf32> to vector<8x64xf32>
    %6 = arith.addf %3, %5 : vector<8x64xf32>
    %cst_5 = arith.constant 5.000000e-01 : f32
    %7 = vector.broadcast %cst_5 : f32 to vector<8x64xf32>
    %8 = arith.mulf %7, %6 : vector<8x64xf32>
    %cst_6 = arith.constant 0.707106769 : f32
    %9 = vector.broadcast %cst_6 : f32 to vector<8x64xf32>
    %10 = arith.mulf %6, %9 : vector<8x64xf32>
    %11 = math.erf %10 : vector<8x64xf32>
    %cst_7 = arith.constant 1.000000e+00 : f32
    %12 = vector.broadcast %cst_7 : f32 to vector<8x64xf32>
    %13 = arith.addf %12, %11 : vector<8x64xf32>
    %14 = arith.mulf %8, %13 : vector<8x64xf32>
    %c0_8 = arith.constant 0 : index
    %c0_9 = arith.constant 0 : index
    %15 = vector.load %arg4[%c0_8, %c0_9] : memref<32x64xbf16, #tpu.memory_space<vmem>>, vector<32x64xbf16>
    %16 = arith.truncf %14 : vector<8x64xf32> to vector<8x64xbf16>
    %cst_10 = arith.constant dense<0.000000e+00> : vector<8x32xf32>
    %17 = tpu.matmul %16, %15, %cst_10 {dimension_numbers = #tpu.dot_dimension_numbers<[1], [1], [0], [0], [0, 0, 1, 0], [], []>} : vector<8x64xbf16>, vector<32x64xbf16>, vector<8x32xf32> -> vector<8x32xf32>
    %c0_11 = arith.constant 0 : index
    %c0_12 = arith.constant 0 : index
    %18 = vector.load %arg5[%c0_11, %c0_12] : memref<1x32xf32, #tpu.memory_space<vmem>>, vector<1x32xf32>
    %19 = vector.broadcast %18 : vector<1x32xf32> to vector<8x32xf32>
    %20 = arith.addf %17, %19 : vector<8x32xf32>
    %21 = arith.addf %0, %20 : vector<8x32xf32>
    %c0_13 = arith.constant 0 : index
    %c0_14 = arith.constant 0 : index
    %22 = vector.load %arg6[%c0_13, %c0_14] : memref<1x32xf32, #tpu.memory_space<vmem>>, vector<1x32xf32>
    %c0_15 = arith.constant 0 : index
    %c0_16 = arith.constant 0 : index
    %23 = vector.load %arg7[%c0_15, %c0_16] : memref<1x32xf32, #tpu.memory_space<vmem>>, vector<1x32xf32>
    %cst_17 = arith.constant dense<0.000000e+00> : vector<8xf32>
    %24 = vector.multi_reduction <add>, %21, %cst_17 [1] : vector<8x32xf32> to vector<8xf32>
    %25 = vector.shape_cast %24 : vector<8xf32> to vector<8x1xf32>
    %cst_18 = arith.constant 3.200000e+01 : f32
    %26 = vector.broadcast %cst_18 : f32 to vector<8x1xf32>
    %27 = arith.divf %25, %26 : vector<8x1xf32>
    %28 = vector.broadcast %27 : vector<8x1xf32> to vector<8x32xf32>
    %29 = arith.subf %21, %28 : vector<8x32xf32>
    %30 = arith.mulf %29, %29 : vector<8x32xf32>
    %cst_19 = arith.constant dense<0.000000e+00> : vector<8xf32>
    %31 = vector.multi_reduction <add>, %30, %cst_19 [1] : vector<8x32xf32> to vector<8xf32>
    %32 = vector.shape_cast %31 : vector<8xf32> to vector<8x1xf32>
    %cst_20 = arith.constant 3.200000e+01 : f32
    %33 = vector.broadcast %cst_20 : f32 to vector<8x1xf32>
    %34 = arith.divf %32, %33 : vector<8x1xf32>
    %35 = vector.broadcast %27 : vector<8x1xf32> to vector<8x32xf32>
    %36 = arith.subf %21, %35 : vector<8x32xf32>
    %cst_21 = arith.constant 9.99999974E-6 : f32
    %37 = vector.broadcast %cst_21 : f32 to vector<8x1xf32>
    %38 = arith.addf %34, %37 : vector<8x1xf32>
    %39 = math.rsqrt %38 : vector<8x1xf32>
    %40 = vector.broadcast %39 : vector<8x1xf32> to vector<8x32xf32>
    %41 = arith.mulf %36, %40 : vector<8x32xf32>
    %42 = vector.broadcast %22 : vector<1x32xf32> to vector<8x32xf32>
    %43 = arith.mulf %41, %42 : vector<8x32xf32>
    %44 = vector.broadcast %23 : vector<1x32xf32> to vector<8x32xf32>
    %45 = arith.addf %43, %44 : vector<8x32xf32>
    %c0_22 = arith.constant 0 : index
    %c0_23 = arith.constant 0 : index
    %46 = vector.load %arg8[%c0_22, %c0_23] : memref<8x32xf32, #tpu.memory_space<vmem>>, vector<8x32xf32>
    tpu.vector_store %arg8[%c0_22, %c0_23], %45 {strides = array<i32>} : memref<8x32xf32, #tpu.memory_space<vmem>>, vector<8x32xf32>,
    return
  }
  func.func @transform_0(%arg0: i32) -> (i32, i32) {
    %c0_i32 = arith.constant 0 : i32
    %c0_i32_0 = arith.constant 0 : i32
    return %arg0, %c0_i32 : i32, i32
  }
  func.func @transform_1(%arg0: i32) -> (i32, i32) {
    %c0_i32 = arith.constant 0 : i32
    %c0_i32_0 = arith.constant 0 : i32
    %c0_i32_1 = arith.constant 0 : i32
    return %c0_i32, %c0_i32_0 : i32, i32
  }
  func.func @transform_2(%arg0: i32) -> (i32, i32) {
    %c0_i32 = arith.constant 0 : i32
    %c0_i32_0 = arith.constant 0 : i32
    %c0_i32_1 = arith.constant 0 : i32
    return %c0_i32, %c0_i32_0 : i32, i32
  }
  func.func @transform_3(%arg0: i32) -> (i32, i32) {
    %c0_i32 = arith.constant 0 : i32
    %c0_i32_0 = arith.constant 0 : i32
    %c0_i32_1 = arith.constant 0 : i32
    return %c0_i32, %c0_i32_0 : i32, i32
  }
  func.func @transform_4(%arg0: i32) -> (i32, i32) {
    %c0_i32 = arith.constant 0 : i32
    %c0_i32_0 = arith.constant 0 : i32
    %c0_i32_1 = arith.constant 0 : i32
    return %c0_i32, %c0_i32_0 : i32, i32
  }
  func.func @transform_5(%arg0: i32) -> (i32, i32) {
    %c0_i32 = arith.constant 0 : i32
    %c0_i32_0 = arith.constant 0 : i32
    %c0_i32_1 = arith.constant 0 : i32
    return %c0_i32, %c0_i32_0 : i32, i32
  }
  func.func @transform_6(%arg0: i32) -> (i32, i32) {
    %c0_i32 = arith.constant 0 : i32
    %c0_i32_0 = arith.constant 0 : i32
    %c0_i32_1 = arith.constant 0 : i32
    return %c0_i32, %c0_i32_0 : i32, i32
  }
  func.func @transform_7(%arg0: i32) -> (i32, i32) {
    %c0_i32 = arith.constant 0 : i32
    %c0_i32_0 = arith.constant 0 : i32
    return %arg0, %c0_i32 : i32, i32
  }
}

</mosaic_0001>

<bundles_post_ra>
// kernel: encoder_layer_forward.6
= control target key start
LH: loop header
LB: loop body
LE: loop exit
PB: predicated region body
PF: predicated region fallthrough
CT: control target
= control target key end

     0   :  { %s522_s21 = smov 0   ;;  %s567_s0 = inlined_call_operand.vmem [shape: bf16[16,32], index: 0, kind: input, shape index: {}]   ;;  %s568_s1 = inlined_call_operand.vmem [shape: bf16[32,32], index: 1, kind: input, shape index: {}]   ;;  %s569_s2 = inlined_call_operand.vmem [shape: f32[1,32], index: 2, kind: input, shape index: {}]   ;;  %s570_s3 = inlined_call_operand.vmem [shape: f32[16,32], index: 3, kind: input, shape index: {}]   ;;  %s571_s4 = inlined_call_operand.vmem [shape: f32[1,32], index: 4, kind: input, shape index: {}]   ;;  %s572_s5 = inlined_call_operand.vmem [shape: f32[1,32], index: 5, kind: input, shape index: {}]   ;;  %s573_s6 = inlined_call_operand.vmem [shape: f32[16,32], index: 6, kind: output, shape index: {}]  }
   0x1 LB: > { %s436_s22 = sadd.s32 4294967295, %s483_s21   ;;  %p440_p0 = scmp.ge.s32.totalorder %s483_s21, 1  ;;  %s483_s21 = sphi %s522_s21, %s16_s21  }
   0x2   : > { %p220_p1 = scmp.lt.s32.totalorder %s483_s21, 3 }
   0x4   : > { %p221_p2 = pnand %p440_p0, %p220_p1 }
   0x5   : > { %v473_v0 = vld [vmem:[%s568_s1] sm:$0xff] (!%p221_p2)   ;;  %v485_v1 = vmov (!%p221_p2), 0.0   ;;  %vm281_vm0 = vcmask (!%p221_p2), 261120   ;;  %p252_p3 = scmp.lt.s32.totalorder (!%p221_p2), %s436_s22, 1  ;;  %vm486_vm1 = vmmov (!%p221_p2), 0   ;;  %v474_v3 = vld [vmem:[%s568_s1 + $0x8] sm:$0xff] (!%p221_p2)  }
   0x6   : > { %224 = sbr.rel (%p221_p2) target bundleno = 552 (0x228), region = 44  ;;  %455 = vmatprep.subr.bf16.mxu0 (!%p221_p2), %v485_v1  ;;  %v286_v2 = vsel (!%p221_p2), %vm281_vm0, %v473_v0, 0  ;;  %459 = vmatprep.mubr.msk.bf16.mxu0 (!%p221_p2), %vm486_vm1, %v485_v1  ;;  %v289_v4 = vsel (!%p221_p2), %vm281_vm0, %v474_v3, 0  ;;  %v447_v8 = vld [vmem:[%s569_s2] ss:$0 sm:$0xff] (!%p221_p2) }
   0x7   : > { %456 = vmatpush3.bf16.xpose.msra.mxu0 (!%p221_p2), %v286_v2  ;;  %v448_v24 = vld [vmem:[%s571_s4] ss:$0 sm:$0xff] (!%p221_p2) }
   0x8   : > { %457 = vmatprep.subr.bf16.mxu0 (!%p221_p2), %v485_v1  ;;  %v449_v26 = vld [vmem:[%s572_s5] ss:$0 sm:$0xff] (!%p221_p2) }
   0xd   : > { %s575_s22 = smov (!%p252_p3, %s436_s22), 1 }
   0xe   : > { %s441_s27 = sshll.u32 %s575_s22, 2  ;;  %s442_s7 = sshll.u32 %s575_s22, 3 }
   0xf   : > { %458 = vmatpush3.bf16.xpose.msra.mxu0 %v289_v4  ;;  %s255_s30 = scalar_lea.vmem %s567_s0, %s441_s27  ;;  %s259_s10 = scalar_lea.vmem %s570_s3, %s442_s7 }
  0x10   : > { %v266_v5 = vld [vmem:[%s255_s30] sm:$0xf]  ;;  %s263_s19 = scalar_lea.vmem %s573_s6, %s442_s7 }
  0x11   : > { %v265_v6 = vld [vmem:[%s259_s10] sm:$0xff] }
  0x16   : > { %460 = vmatmul.mubr.msk.bf16.vlgmr.msra.gmra.mrb[0].mxu0 %vm281_vm0, %v266_v5 }
  0xe9   : > { %v325_v7 = vpop.f32.mrb[0].mxu0 }
  0xea   : > { %v331_v9 = vadd.f32 %v325_v7, %v265_v6  ;;  %v461_v10 = vpop.f32.mrb[1].mxu0 }
  0xeb   : > { %v328_v11 = vpop.f32.mrb[2].mxu0 }
  0xec   : > { %v462_v12 = vpop.f32.mrb[3].mxu0  ;;  %v339_v13 = vadd.f32 %v447_v8, %v331_v9 }
  0xee   : > { %v342_v14 = vsel %vm281_vm0, %v339_v13, 0.0 }
  0xef   : > { %343 = vadd.xlane.f32.xlu0 %v342_v14 }
 0x17c   : > { %v344_v15 = vpop.xlane.xlu0 %343 }
 0x17d   : > { %v346_v16 = vmul.f32 0.03125, %v344_v15 }
 0x17f   : > { %v347_v17 = vsub.f32 %v339_v13, %v346_v16 }
 0x181   : > { %v348_v18 = vmul.f32 %v347_v17, %v347_v17 }
 0x183   : > { %v349_v19 = vsel %vm281_vm0, %v348_v18, 0.0 }
 0x184   : > { %350 = vadd.xlane.f32.xlu0 %v349_v19 }
 0x211   : > { %v351_v20 = vpop.xlane.xlu0 %350 }
 0x212   : > { %v352_v21 = vmul.f32 0.03125, %v351_v20 }
 0x214   : > { %v353_v22 = vadd.f32 1e-05, %v352_v21 }
 0x216   : > { %475 = vrsqrt.f32 %v353_v22 }
 0x220   : > { %v476_v23 = vpop.eup %475 }
 0x221   : > { %v355_v25 = vmul.f32 %v476_v23, %v347_v17 }
 0x223   : > { %v362_v27 = vmul.f32 %v448_v24, %v355_v25 }
 0x225   : > { %v369_v28 = vadd.f32 %v449_v26, %v362_v27 }
 0x227   : > { %370 = vst.msk [vmem:[%s263_s19] sm:$0xff] %vm281_vm0, %v369_v28 }
 0x228 PF: > { %s16_s21 = sadd.s32 1, %s483_s21  }
 0x229   : > { %p13_p4 = scmp.ge.s32.totalorder %s16_s21, 4  }
 0x22b   :  { %15 = sbr.rel (!%p13_p4) target bundleno = 1 (0x1), region = 77 }

// kernel: encoder_layer_forward.4
= control target key start
LH: loop header
LB: loop body
LE: loop exit
PB: predicated region body
PF: predicated region fallthrough
CT: control target
= control target key end

     0   :  { %15 = vsyncpa [#allocation3], 0  ;;  %s882_s30 = smov 0   ;;  %s987_s0 = inlined_call_operand.vmem [shape: f32[16,32], index: 0, kind: input, shape index: {}]   ;;  %s988_s1 = inlined_call_operand.vmem [shape: bf16[32,32], index: 1, kind: input, shape index: {}]   ;;  %s989_s2 = inlined_call_operand.vmem [shape: bf16[32,32], index: 2, kind: input, shape index: {}]   ;;  %s990_s3 = inlined_call_operand.vmem [shape: bf16[32,32], index: 3, kind: input, shape index: {}]   ;;  %s991_s4 = inlined_call_operand.vmem [shape: f32[1,32], index: 4, kind: input, shape index: {}]   ;;  %s992_s5 = inlined_call_operand.vmem [shape: f32[1,32], index: 5, kind: input, shape index: {}]   ;;  %s993_s6 = inlined_call_operand.hbm [shape: f32[1,32], index: 6, kind: input, shape index: {}]   ;;  %s994_s7 = inlined_call_operand.vmem [shape: bf16[16,32], index: 7, kind: output, shape index: {0}]   ;;  %s995_s8 = inlined_call_operand.vmem [shape: bf16[16,32], index: 8, kind: output, shape index: {1}]   ;;  %s996_s9 = inlined_call_operand.vmem [shape: bf16[16,32], index: 9, kind: output, shape index: {2}]  }
   0x1 LB: > { %s888_s10 = sadd.s32 4294967295, %s827_s30   ;;  %p706_p0 = scmp.ge.s32.totalorder %s827_s30, 1  ;;  %s827_s30 = sphi %s882_s30, %s21_s30  }
   0x2   : > { %p256_p1 = scmp.lt.s32.totalorder %s827_s30, 3  ;;  %p997_p3 = scmp.eq.s32.totalorder %s888_s10, 0 }
   0x3   : > { %s829_s12 = smov [#allocation2]   ;;  %s789_s17 = scalar_lea.hbm %s993_s6, 16 }
   0x4   : > { %p892_p2 = pnand %p706_p0, %p256_p1  ;;  %s284_s13 = sshll.u32 %s829_s12, 4  ;;  %s285_s13 = int_to_ptr.vmem [resolvable:$true] %s284_s13 }
   0x5   : > { %p790_p6 = scmp.ne.s32.totalorder %s993_s6, %s789_s17  ;;  %p796_p10 = scmp.lt.u32.totalorder %s789_s17, %s993_s6 }
   0x6   : > { %s999_s11 = scalar_select %p892_p2, 1, 0 }
   0x7   : > { %p766_p4 = pneg %p892_p2 }
   0x9   : > { %p901_p5 = pnand %p997_p3, %p766_p4 }
   0xb   : > { %p791_p7 = pneg %p901_p5 }
   0xd   : > { %p792_p8 = pnand %p791_p7, %p790_p6 }
   0xf   : > { %p793_p9 = pneg %p792_p8 }
  0x11   : > { %p798_p11 = pnand %p796_p10, %p793_p9 }
  0x13   : > { %801 = shalt.err (!%p798_p11)
}
  0x14   : > { %s802_s22 = scalar_lea.vmem %s285_s13, 16  ;;  %s809_s23 = scalar_lea.vmem %s285_s13, 32 }
  0x15   : > { %p803_p12 = scmp.ne.s32.totalorder %s285_s13, %s802_s22  ;;  %p810_p1 = scmp.lt.s32.totalorder %s285_s13, %s285_s13 }
  0x16   : > { %p811_p4 = scmp.lt.s32.totalorder %s809_s23, %s802_s22 }
  0x17   : > { %p805_p13 = pnand %p803_p12, %p791_p7 }
  0x18   : > { %p812_p3 = por %p811_p4, %p810_p1 }
  0x19   : > { %p806_p0 = pneg %p805_p13 }
  0x1b   : > { %p813_p2 = pnand %p812_p3, %p806_p0 }
  0x1d   : > { %816 = shalt.err (!%p813_p2)
}
  0x1e   : > { %769 = dma.hbm_to_vmem [thread:$0]  (!%p901_p5), %s993_s6, 16, %s285_s13, [#allocation3]  }
  0x1f   : > { %p1001_p6 = scmp.ne.s32.totalorder %s999_s11, 0 }
  0x20   : > { %p1002_p8 = scmp.eq.s32.totalorder (!%p1001_p6), %s888_s10, 0 }
  0x21   : > { %304 = sbr.rel (%p1001_p6) target bundleno = 292 (0x124), region = 48 }
  0x28   : > { %822 = dma.done.wait (%p1002_p8), [#allocation3], 16   ;;  %p1003_p7 = pmov %p1002_p8 }
  0x29   : > { %v830_v0 = vmov 0.0   ;;  %vm831_vm0 = vmmov 0   ;;  %p346_p2 = scmp.lt.s32.totalorder %s888_s10, 1  ;;  %vm386_vm1 = vcmask 261120   ;;  %v783_v1 = vld [vmem:[%s988_s1] sm:$0xff]   ;;  %v784_v4 = vld [vmem:[%s988_s1 + $0x8] sm:$0xff]  }
  0x2a   : > { %824 = vsyncadd (%p1003_p7), [#allocation3], 4294967280  ;;  %738 = vmatprep.subr.bf16.mxu0 %v830_v0  ;;  %746 = vmatprep.subr.bf16.mxu1 %v830_v0  ;;  %v391_v2 = vsel %vm386_vm1, %v783_v1, 0  ;;  %v785_v3 = vld [vmem:[%s989_s2] sm:$0xff]   ;;  %v787_v6 = vld [vmem:[%s989_s2 + $0x8] sm:$0xff]   ;;  %v394_v7 = vsel %vm386_vm1, %v784_v4, 0 }
  0x2b   : > { %742 = vmatprep.mubr.msk.bf16.mxu0 %vm831_vm0, %v830_v0  ;;  %750 = vmatprep.mubr.msk.bf16.mxu1 %vm831_vm0, %v830_v0  ;;  %s1005_s10 = smov (!%p346_p2, %s888_s10), 1  ;;  %v461_v5 = vsel %vm386_vm1, %v785_v3, 0  ;;  %v464_v8 = vsel %vm386_vm1, %v787_v6, 0  ;;  %v786_v10 = vld [vmem:[%s990_s3] sm:$0xff]   ;;  %v788_v13 = vld [vmem:[%s990_s3 + $0x8] sm:$0xff]   ;;  %vm437_vm2 = vcmask 257024  }
  0x2c   : > { %739 = vmatpush3.bf16.xpose.msra.mxu0 %v391_v2  ;;  %747 = vmatpush3.bf16.xpose.msra.mxu1 %v461_v5  ;;  %s711_s13 = sshll.u32 %s1005_s10, 3  ;;  %v530_v12 = vsel %vm386_vm1, %v786_v10, 0  ;;  %v533_v14 = vsel %vm386_vm1, %v788_v13, 0  ;;  %v715_v15 = vld [vmem:[%s991_s4] ss:$0 sm:$0xff]  ;;  %s712_s25 = sshll.u32 %s1005_s10, 2 }
  0x2d   : > { %740 = vmatprep.subr.bf16.mxu0 %v830_v0  ;;  %748 = vmatprep.subr.bf16.mxu1 %v830_v0  ;;  %s349_s18 = scalar_lea.vmem %s987_s0, %s711_s13  ;;  %v719_v17 = vld [vmem:[%s992_s5] ss:$0 sm:$0xff]  ;;  %s353_s11 = scalar_lea.vmem %s994_s7, %s712_s25 }
  0x2e   : > { %v363_v9 = vld [vmem:[%s349_s18] sm:$0xff]  ;;  %s357_s13 = scalar_lea.vmem %s995_s8, %s712_s25  ;;  %s361_s16 = scalar_lea.vmem %s996_s9, %s712_s25 }
  0x2f   : > { %v364_v11 = vpack.c.bf16 %v363_v9, %v363_v9  ;;  %v723_v29 = vld [vmem:[#allocation2] ss:$0 sm:$0xff] }
  0x34   : > { %741 = vmatpush3.bf16.xpose.msra.mxu0 %v394_v7  ;;  %749 = vmatpush3.bf16.xpose.msra.mxu1 %v464_v8 }
  0x35   : > { %754 = vmatprep.subr.bf16.mxu0 %v830_v0 }
  0x3b   : > { %743 = vmatmul.mubr.msk.bf16.vlgmr.msra.gmra.mrb[0].mxu0 %vm386_vm1, %v364_v11  ;;  %751 = vmatmul.mubr.msk.bf16.vlgmr.msra.gmra.mrb[0].mxu1 %vm386_vm1, %v364_v11 }
  0x3c   : > { %755 = vmatpush3.bf16.xpose.msra.mxu0 %v530_v12  ;;  %758 = vmatprep.mubr.msk.bf16.mxu0 %vm831_vm0, %v830_v0 }
  0x3d   : > { %756 = vmatprep.subr.bf16.mxu0 %v830_v0 }
  0x44   : > { %757 = vmatpush3.bf16.xpose.msra.mxu0 %v533_v14 }
  0x4b   : > { %759 = vmatmul.mubr.msk.bf16.vlgmr.msra.gmra.mrb[4].mxu0 %vm386_vm1, %v364_v11 }
 0x10e   : > { %v430_v16 = vpop.f32.mrb[0].mxu0  ;;  %v500_v21 = vpop.f32.mrb[0].mxu1 }
 0x10f   : > { %v431_v18 = vadd.f32 %v715_v15, %v430_v16  ;;  %v744_v19 = vpop.f32.mrb[1].mxu0  ;;  %v501_v24 = vadd.f32 %v719_v17, %v500_v21  ;;  %v752_v25 = vpop.f32.mrb[1].mxu1 }
 0x110   : > { %v433_v20 = vpop.f32.mrb[2].mxu0  ;;  %v503_v26 = vpop.f32.mrb[2].mxu1 }
 0x111   : > { %v436_v22 = vpack.c.bf16 %v431_v18, %v431_v18  ;;  %v745_v23 = vpop.f32.mrb[3].mxu0  ;;  %v506_v27 = vpack.c.bf16 %v501_v24, %v501_v24  ;;  %v753_v28 = vpop.f32.mrb[3].mxu1 }
 0x113   : > { %438 = vst.msk [vmem:[%s353_s11] sm:$0xf] %vm437_vm2, %v436_v22  ;;  %507 = vst.msk [vmem:[%s357_s13] sm:$0xf] %vm437_vm2, %v506_v27 }
 0x11e   : > { %v569_v30 = vpop.f32.mrb[4].mxu0 }
 0x11f   : > { %v570_v31 = vadd.f32 %v723_v29, %v569_v30  ;;  %v760_v32 = vpop.f32.mrb[5].mxu0 }
 0x120   : > { %v572_v33 = vpop.f32.mrb[6].mxu0 }
 0x121   : > { %v575_v34 = vpack.c.bf16 %v570_v31, %v570_v31  ;;  %v761_v35 = vpop.f32.mrb[7].mxu0 }
 0x123   : > { %576 = vst.msk [vmem:[%s361_s16] sm:$0xf] %vm437_vm2, %v575_v34 }
 0x124 PF: > { %s21_s30 = sadd.s32 1, %s827_s30  }
 0x125   : > { %p18_p3 = scmp.ge.s32.totalorder %s21_s30, 4  }
 0x127   :  { %20 = sbr.rel (!%p18_p3) target bundleno = 1 (0x1), region = 107 }
 0x12e   :  { %624 = vsyncpa [#allocation3], 1 }
 0x12f   :  { %626 = vsyncpa [#allocation3 + $0x1], 1 }

// kernel: encoder_layer_forward.5
= control target key start
LH: loop header
LB: loop body
LE: loop exit
PB: predicated region body
PF: predicated region fallthrough
CT: control target
= control target key end

     0   :  { %s1274_s15 = smov 0   ;;  %s1276_s16 = smov 0   ;;  %s1443_s0 = inlined_call_operand.vmem [shape: bf16[2,8,32], index: 0, kind: input, shape index: {}]   ;;  %s1444_s1 = inlined_call_operand.vmem [shape: bf16[2,8,32], index: 1, kind: input, shape index: {}]   ;;  %s1445_s2 = inlined_call_operand.vmem [shape: bf16[2,8,32], index: 2, kind: input, shape index: {}]   ;;  %s1446_s3 = inlined_call_operand.vmem [shape: f32[8,8], index: 3, kind: input, shape index: {}]   ;;  %s1447_s4 = inlined_call_operand.vmem [shape: bf16[2,8,32], index: 4, kind: output, shape index: {}]  }
   0x1   :  { %s1278_s17 = smov 0  }
   0x2 LB: > { %s33_s18 = sadd.s32 1, %s1233_s16  ;;  %p1071_p0 = scmp.ge.s32.totalorder %s1237_s17, 1  ;;  %s1237_s17 = sphi %s1278_s17, %s14_s17   ;;  %s1233_s16 = sphi %s1276_s16, %s1449_s16   ;;  %s1229_s15 = sphi %s1274_s15, %s1448_s15  }
   0x3   : > { %p35_p1 = scmp.ge.s32.totalorder %s33_s18, 2  ;;  %p229_p2 = scmp.lt.s32.totalorder %s1237_s17, 3 }
   0x5   : > { %s1451_s18 = smov (%p35_p1, %s33_s18), 0  ;;  %p230_p3 = pnand %p1071_p0, %p229_p2 }
   0x6   : > { %p280_p4 = scmp.lt.s32.totalorder (!%p230_p3), %s1229_s15, 1  ;;  %vm329_vm0 = vcmask (!%p230_p3), 64512   ;;  %v1239_v0 = vmov (!%p230_p3), 0.0   ;;  %vm1240_vm1 = vmmov (!%p230_p3), 0   ;;  %vm320_vm2 = vcmask (!%p230_p3), 7168   ;;  %v1336_v5 = vld [vmem:[%s1446_s3] sm:$0xff] (!%p230_p3) }
   0x7   : > { %233 = sbr.rel (%p230_p3) target bundleno = 1469 (0x5bd), region = 36  ;;  %1105 = vmatprep.subr.bf16.mxu0 (!%p230_p3), %v1239_v0  ;;  %330 = vst.msk [vmem:[#allocation4] sm:$0xff] (!%p230_p3), %vm329_vm0, %v1239_v0  ;;  %331 = vst.msk [vmem:[#allocation4 + $0x8] sm:$0xff] (!%p230_p3), %vm329_vm0, %v1239_v0  ;;  %1107 = vmatprep.mubr.msk.bf16.mxu0 (!%p230_p3), %vm1240_vm1, %v1239_v0  ;;  %v1241_v4 = vmov (!%p230_p3), -1e+30   ;;  %v1242_v12 = vmov (!%p230_p3), 0  }
   0x8   : > { %332 = vst.msk [vmem:[#allocation4 + $0x10] sm:$0xff] (!%p230_p3), %vm329_vm0, %v1239_v0  ;;  %333 = vst.msk [vmem:[#allocation4 + $0x18] sm:$0xff] (!%p230_p3), %vm329_vm0, %v1239_v0  ;;  %1111 = vmatprep.subr.bf16.mxu1 (!%p230_p3), %v1239_v0  ;;  %1113 = vmatprep.mubr.msk.bf16.mxu1 (!%p230_p3), %vm1240_vm1, %v1239_v0  ;;  %s1243_s28 = smov (!%p230_p3), 120   ;;  %s1244_s29 = smov (!%p230_p3), 112   ;;  %vm413_vm3 = vcmask (!%p230_p3), 1043456   ;;  %vm933_vm4 = vcmask (!%p230_p3), 130048  }
   0x9   : > { %321 = vst.msk [vmem:[#allocation2] sm:$0xff] (!%p230_p3), %vm320_vm2, %v1241_v4  ;;  %322 = vst.msk [vmem:[#allocation2 + $0x8] sm:$0xff] (!%p230_p3), %vm320_vm2, %v1241_v4  ;;  %1187 = vset.pattern.permute.xlu0 (!%p230_p3), %v1242_v12  ;;  %1188 = vset.pattern.permute.xlu1 (!%p230_p3), %v1242_v12  ;;  %s1245_s30 = smov (!%p230_p3), 104   ;;  %s1246_s8 = smov (!%p230_p3), 8   ;;  %vm935_vm5 = vcmask (!%p230_p3), 195584   ;;  %vm938_vm6 = vcmask (!%p230_p3), 257024  }
   0xa   : > { %323 = vst.msk [vmem:[#allocation2 + $0x10] sm:$0xff] (!%p230_p3), %vm320_vm2, %v1241_v4  ;;  %324 = vst.msk [vmem:[#allocation2 + $0x18] sm:$0xff] (!%p230_p3), %vm320_vm2, %v1241_v4  ;;  %s1247_s9 = smov (!%p230_p3), 16   ;;  %s1248_s10 = smov (!%p230_p3), 24  }
   0xb   : > { %325 = vst.msk [vmem:[#allocation3] sm:$0xff] (!%p230_p3), %vm320_vm2, %v1239_v0  ;;  %326 = vst.msk [vmem:[#allocation3 + $0x8] sm:$0xff] (!%p230_p3), %vm320_vm2, %v1239_v0 }
   0xc   : > { %327 = vst.msk [vmem:[#allocation3 + $0x10] sm:$0xff] (!%p230_p3), %vm320_vm2, %v1239_v0  ;;  %328 = vst.msk [vmem:[#allocation3 + $0x18] sm:$0xff] (!%p230_p3), %vm320_vm2, %v1239_v0 }
   0xe   : > { %s1453_s15 = smov (!%p280_p4, %s1229_s15), 1 }
   0xf   : > { %s1306_s19 = sshll.u32 %s1453_s15, 2 }
  0x10   : > { %s293_s22 = scalar_lea.vmem %s1444_s1, %s1306_s19  ;;  %s286_s25 = scalar_lea.vmem %s1443_s0, %s1306_s19  ;;  %v1346_v15 = vld [vmem:[#allocation2] sm:$0xff]  ;;  %v524_v57 = vld [vmem:[#allocation2 + $0x8] sm:$0xff] }
  0x11   : > { %v335_v1 = vld [vmem:[%s293_s22] sm:$0xf]  ;;  %s300_s7 = scalar_lea.vmem %s1445_s2, %s1306_s19  ;;  %v662_v61 = vld [vmem:[#allocation2 + $0x10] sm:$0xff]  ;;  %s314_s13 = scalar_lea.vmem %s1447_s4, %s1306_s19 }
  0x12   : > { %v343_v2 = vsel %vm329_vm0, %v335_v1, 0  ;;  %v334_v3 = vld [vmem:[%s286_s25] sm:$0xf]  ;;  %v1079_v13 = vcombine.low %v335_v1, %v335_v1 }
  0x13   : > { %1106 = vmatpush3.bf16.xpose.msra.mxu0 %v343_v2  ;;  %v1078_v14 = vcombine.low %v334_v3, %v334_v3  ;;  %v1360_v19 = vld [vmem:[%s300_s7] sm:$0xf]  ;;  %v797_v2 = vld [vmem:[#allocation2 + $0x18] sm:$0xff] }
  0x14   : > { %1123 = vmatprep.subr.bf16.mxu0 %v1239_v0  ;;  %475 = vrot.lane.b32.xlu1 %v1079_v13, %s1243_s28  ;;  %v415_v20 = vsel %vm413_vm3, %v1360_v19, 0 }
  0x15   : > { %1112 = vmatpush3.bf16.msra.mxu1 %v415_v20 }
  0x16   : > { %1117 = vmatprep.subr.bf16.mxu1 %v1239_v0 }
  0x18   : > { %470 = vrot.lane.b32.xlu1 %v1078_v14, %s1243_s28 }
  0x1a   : > { %1108 = vmatmul.mubr.msk.bf16.vlgmr.msra.gmra.mrb[0].mxu0 %vm329_vm0, %v334_v3 }
  0x1b   : > { %1125 = vmatprep.mubr.msk.bf16.mxu0 %vm1240_vm1, %v1239_v0 }
  0x1c   : > { %613 = vrot.lane.b32.xlu1 %v1079_v13, %s1244_s29 }
  0x20   : > { %611 = vrot.lane.b32.xlu1 %v1078_v14, %s1244_s29 }
  0x24   : > { %748 = vrot.lane.b32.xlu1 %v1079_v13, %s1245_s30 }
  0x28   : > { %746 = vrot.lane.b32.xlu1 %v1078_v14, %s1245_s30 }
  0x86   : > { %v476_v24 = vpop.permute.xlu1 %475 }
  0x87   : > { %v481_v27 = vsel %vm329_vm0, %v476_v24, 0 }
  0x8a   : > { %v471_v25 = vpop.permute.xlu1 %470 }
  0x8e   : > { %v614_v29 = vpop.permute.xlu1 %613 }
  0x8f   : > { %v619_v31 = vsel %vm329_vm0, %v614_v29, 0 }
  0x92   : > { %v612_v30 = vpop.permute.xlu1 %611 }
  0x96   : > { %v749_v32 = vpop.permute.xlu1 %748 }
  0x97   : > { %v754_v33 = vsel %vm329_vm0, %v749_v32, 0 }
  0x9a   : > { %v747_v34 = vpop.permute.xlu1 %746 }
  0xed   : > { %v379_v6 = vpop.f32.mrb[0].mxu0 }
  0xee   : > { %v380_v7 = vadd.f32 %v379_v6, %v1336_v5  ;;  %v1109_v8 = vpop.f32.mrb[1].mxu0 }
  0xef   : > { %v382_v9 = vpop.f32.mrb[2].mxu0 }
  0xf0   : > { %v1110_v10 = vpop.f32.mrb[3].mxu0  ;;  %v386_v11 = vsel %vm329_vm0, %v380_v7, -inf }
  0xf1   : > { %387 = vmax.xlane.f32.xlu0 %v386_v11 }
 0x17e   : > { %v388_v16 = vpop.xlane.xlu0 %387 }
 0x17f   : > { %v1349_v17 = vmax.f32 %v1346_v15, %v388_v16 }
 0x181   : > { %v390_v18 = vsub.f32 %v1346_v15, %v1349_v17  ;;  %466 = vst.msk [vmem:[#allocation2] sm:$0xff] %vm320_vm2, %v1349_v17  ;;  %395 = vperm.xlu0 %1187, %v1349_v17  }
 0x200   : > { %v396_v21 = vpop.permute.xlu0 %395 }
 0x201   : > { %v398_v22 = vsub.f32 %v380_v7, %v396_v21 }
 0x203   : > { %v399_v23 = vmul.f32 1.442695, %v398_v22 }
 0x205   : > { %1191 = vpow2.f32 %v399_v23 }
 0x20f   : > { %v1365_v26 = vpop.eup %1191 }
 0x210   : > { %v409_v28 = vpack.c.bf16 %v1365_v26, %v1365_v26  ;;  %v403_v22 = vsel %vm329_vm0, %v1365_v26, 0.0 }
 0x212   : > { %1114 = vmatmul.mubr.msk.bf16.vlgmr.msra.gmra.mrb[0].mxu1 %vm329_vm0, %v409_v28 }
 0x213   : > { %1118 = vmatpush3.bf16.xpose.msra.mxu1 %v481_v27  ;;  %1119 = vmatprep.mubr.msk.bf16.mxu1 %vm1240_vm1, %v1239_v0 }
 0x214   : > { %1129 = vmatprep.subr.bf16.mxu1 %v1239_v0 }
 0x21a   : > { %1120 = vmatmul.mubr.msk.bf16.vlgmr.msra.gmra.mrb[4].mxu1 %vm329_vm0, %v471_v25 }
 0x21b   : > { %1130 = vmatpush3.bf16.xpose.msra.mxu1 %v619_v31  ;;  %1131 = vmatprep.mubr.msk.bf16.mxu1 %vm1240_vm1, %v1239_v0 }
 0x21c   : > { %1141 = vmatprep.subr.bf16.mxu1 %v1239_v0 }
 0x222   : > { %1132 = vmatmul.mubr.msk.bf16.vlgmr.msra.gmra.mrb[8].mxu1 %vm329_vm0, %v612_v30 }
 0x223   : > { %1142 = vmatpush3.bf16.xpose.msra.mxu1 %v754_v33  ;;  %1143 = vmatprep.mubr.msk.bf16.mxu1 %vm1240_vm1, %v1239_v0 }
 0x22a   : > { %1144 = vmatmul.mubr.msk.bf16.vlgmr.msra.gmra.mrb[12].mxu1 %vm329_vm0, %v747_v34 }
 0x2e5   : > { %v1384_v35 = vpop.f32.mrb[0].mxu1 }
 0x2e6   : > { %v1115_v36 = vpop.f32.mrb[1].mxu1 }
 0x2e7   : > { %v454_v37 = vpop.f32.mrb[2].mxu1 }
 0x2e8   : > { %v1116_v38 = vpop.f32.mrb[3].mxu1 }
 0x2ed   : > { %v517_v39 = vpop.f32.mrb[4].mxu1 }
 0x2ee   : > { %v518_v40 = vadd.f32 %v517_v39, %v1336_v5  ;;  %v1121_v41 = vpop.f32.mrb[5].mxu1  ;;  %v391_v39 = vmul.f32 1.442695, %v390_v18  ;;  %v679_v18 = vld [vmem:[#allocation3 + $0x10] sm:$0xff] }
 0x2ef   : > { %v520_v42 = vpop.f32.mrb[6].mxu1 }
 0x2f0   : > { %v1122_v43 = vpop.f32.mrb[7].mxu1  ;;  %v525_v44 = vsel %vm329_vm0, %v518_v40, -inf }
 0x2f1   : > { %526 = vmax.xlane.f32.xlu1 %v525_v44  ;;  %v541_v44 = vld [vmem:[#allocation3 + $0x8] sm:$0xff] }
 0x2f5   : > { %v655_v45 = vpop.f32.mrb[8].mxu1 }
 0x2f6   : > { %v656_v46 = vadd.f32 %v655_v45, %v1336_v5  ;;  %v1133_v47 = vpop.f32.mrb[9].mxu1 }
 0x2f7   : > { %v658_v48 = vpop.f32.mrb[10].mxu1 }
 0x2f8   : > { %v1134_v49 = vpop.f32.mrb[11].mxu1  ;;  %v663_v50 = vsel %vm329_vm0, %v656_v46, -inf }
 0x2f9   : > { %664 = vmax.xlane.f32.xlu0 %v663_v50 }
 0x2fd   : > { %v790_v51 = vpop.f32.mrb[12].mxu1 }
 0x2fe   : > { %v791_v52 = vadd.f32 %v790_v51, %v1336_v5  ;;  %v1145_v53 = vpop.f32.mrb[13].mxu1  ;;  %v1081_v5 = vcombine.low %v1360_v19, %v1360_v19 }
 0x2ff   : > { %v793_v54 = vpop.f32.mrb[14].mxu1  ;;  %v814_v53 = vld [vmem:[#allocation3 + $0x18] sm:$0xff] }
 0x300   : > { %v1146_v55 = vpop.f32.mrb[15].mxu1  ;;  %v798_v56 = vsel %vm329_vm0, %v791_v52, -inf }
 0x301   : > { %799 = vmax.xlane.f32.xlu1 %v798_v56 }
 0x37e   : > { %v527_v58 = vpop.xlane.xlu1 %526 }
 0x37f   : > { %v528_v59 = vmax.f32 %v524_v57, %v527_v58 }
 0x381   : > { %v529_v60 = vsub.f32 %v524_v57, %v528_v59  ;;  %610 = vst.msk [vmem:[#allocation2 + $0x8] sm:$0xff] %vm320_vm2, %v528_v59  ;;  %534 = vperm.xlu1 %1188, %v528_v59  }
 0x383   : > { %v530_v25 = vmul.f32 1.442695, %v529_v60  ;;  %v457_v60 = vld [vmem:[#allocation4] sm:$0xff] }
 0x386   : > { %v665_v62 = vpop.xlane.xlu0 %664 }
 0x387   : > { %v666_v63 = vmax.f32 %v662_v61, %v665_v62 }
 0x389   : > { %v667_v1 = vsub.f32 %v662_v61, %v666_v63  ;;  %745 = vst.msk [vmem:[#allocation2 + $0x10] sm:$0xff] %vm320_vm2, %v666_v63  ;;  %672 = vperm.xlu0 %1187, %v666_v63  }
 0x38b   : > { %v668_v26 = vmul.f32 1.442695, %v667_v1 }
 0x38e   : > { %v800_v3 = vpop.xlane.xlu1 %799 }
 0x38f   : > { %v801_v4 = vmax.f32 %v797_v2, %v800_v3 }
 0x391   : > { %v802_v6 = vsub.f32 %v797_v2, %v801_v4  ;;  %880 = vst.msk [vmem:[#allocation2 + $0x18] sm:$0xff] %vm320_vm2, %v801_v4  ;;  %807 = vperm.xlu1 %1188, %v801_v4  }
 0x393   : > { %v803_v41 = vmul.f32 1.442695, %v802_v6 }
 0x395   : > { %552 = vrot.lane.b32.xlu1 %v1081_v5, %s1243_s28 }
 0x399   : > { %687 = vrot.lane.b32.xlu1 %v1081_v5, %s1244_s29 }
 0x39d   : > { %822 = vrot.lane.b32.xlu1 %v1081_v5, %s1245_s30  ;;  %v601_v5 = vld [vmem:[#allocation4 + $0x8] sm:$0xff] }
 0x400   : > { %v535_v7 = vpop.permute.xlu1 %534 }
 0x401   : > { %v537_v8 = vsub.f32 %v518_v40, %v535_v7 }
 0x403   : > { %v538_v9 = vmul.f32 1.442695, %v537_v8 }
 0x405   : > { %1193 = vpow2.f32 %v538_v9 }
 0x408   : > { %v673_v10 = vpop.permute.xlu0 %672 }
 0x409   : > { %v675_v11 = vsub.f32 %v656_v46, %v673_v10  ;;  %v401_v46 = vld [vmem:[#allocation3] sm:$0xff] }
 0x40b   : > { %v676_v12 = vmul.f32 1.442695, %v675_v11 }
 0x40d   : > { %1195 = vpow2.f32 %v676_v12 }
 0x40f   : > { %v1194_v13 = vpop.eup %1193 }
 0x410   : > { %v808_v14 = vpop.permute.xlu1 %807  ;;  %v543_v16 = vsel %vm329_vm0, %v1194_v13, 0.0  ;;  %v548_v27 = vpack.c.bf16 %v1194_v13, %v1194_v13  ;;  %v736_v13 = vld [vmem:[#allocation4 + $0x10] sm:$0xff] }
 0x411   : > { %v810_v19 = vsub.f32 %v791_v52, %v808_v14  ;;  %544 = vadd.xlane.f32.xlu1 %v543_v16 }
 0x413   : > { %v811_v20 = vmul.f32 1.442695, %v810_v19 }
 0x414   : > { %v553_v21 = vpop.permute.xlu1 %552 }
 0x415   : > { %1197 = vpow2.f32 %v811_v20  ;;  %v558_v23 = vsel %vm413_vm3, %v553_v21, 0  ;;  %404 = vadd.xlane.f32.xlu1 %v403_v22 }
 0x416   : > { %1124 = vmatpush3.bf16.msra.mxu0 %v558_v23  ;;  %1199 = vpow2.f32 %v530_v25  ;;  %v871_v23 = vld [vmem:[#allocation4 + $0x18] sm:$0xff] }
 0x417   : > { %v1196_v24 = vpop.eup %1195  ;;  %1135 = vmatprep.subr.bf16.mxu0 %v1239_v0  ;;  %1201 = vpow2.f32 %v668_v26 }
 0x418   : > { %v681_v28 = vsel %vm329_vm0, %v1196_v24, 0.0  ;;  %v688_v29 = vpop.permute.xlu1 %687  ;;  %v686_v33 = vpack.c.bf16 %v1196_v24, %v1196_v24  ;;  %1203 = vpow2.f32 %v391_v39 }
 0x419   : > { %682 = vadd.xlane.f32.xlu0 %v681_v28  ;;  %1126 = vmatmul.mubr.msk.bf16.vlgmr.msra.gmra.mrb[4].mxu0 %vm329_vm0, %v548_v27  ;;  %v693_v30 = vsel %vm413_vm3, %v688_v29, 0  ;;  %1205 = vpow2.f32 %v803_v41 }
 0x41a   : > { %1136 = vmatpush3.bf16.msra.mxu0 %v693_v30  ;;  %1137 = vmatprep.mubr.msk.bf16.mxu0 %vm1240_vm1, %v1239_v0 }
 0x41b   : > { %1147 = vmatprep.subr.bf16.mxu0 %v1239_v0 }
 0x41c   : > { %v823_v31 = vpop.permute.xlu1 %822 }
 0x41d   : > { %v828_v34 = vsel %vm413_vm3, %v823_v31, 0 }
 0x41f   : > { %v1198_v32 = vpop.eup %1197 }
 0x420   : > { %v816_v36 = vsel %vm329_vm0, %v1198_v32, 0.0  ;;  %v1200_v37 = vpop.eup %1199  ;;  %v821_v38 = vpack.c.bf16 %v1198_v32, %v1198_v32 }
 0x421   : > { %817 = vadd.xlane.f32.xlu0 %v816_v36  ;;  %1138 = vmatmul.mubr.msk.bf16.vlgmr.msra.gmra.mrb[8].mxu0 %vm329_vm0, %v686_v33  ;;  %v1202_v40 = vpop.eup %1201 }
 0x422   : > { %1148 = vmatpush3.bf16.msra.mxu0 %v828_v34  ;;  %1149 = vmatprep.mubr.msk.bf16.mxu0 %vm1240_vm1, %v1239_v0  ;;  %v1204_v42 = vpop.eup %1203  ;;  %v542_v0 = vmul.f32 %v1200_v37, %v541_v44  ;;  %v680_v49 = vmul.f32 %v1202_v40, %v679_v18 }
 0x423   : > { %v1206_v43 = vpop.eup %1205  ;;  %v402_v15 = vmul.f32 %v1204_v42, %v401_v46 }
 0x424   : > { %v815_v55 = vmul.f32 %v1206_v43, %v814_v53 }
 0x426   : > { %604 = vperm.xlu1 %1188, %v1200_v37  }
 0x429   : > { %1150 = vmatmul.mubr.msk.bf16.vlgmr.msra.gmra.mrb[12].mxu0 %vm329_vm0, %v821_v38 }
 0x42a   : > { %739 = vperm.xlu1 %1188, %v1202_v40  }
 0x437   : > { %460 = vperm.xlu0 %1187, %v1204_v42  }
 0x43b   : > { %874 = vperm.xlu0 %1187, %v1206_v43  }
 0x49e   : > { %v545_v45 = vpop.xlane.xlu1 %544 }
 0x49f   : > { %v546_v47 = vadd.f32 %v545_v45, %v542_v0 }
 0x4a1   : > { %547 = vst.msk [vmem:[#allocation3 + $0x8] sm:$0xff] %vm320_vm2, %v546_v47 }
 0x4a2   : > { %v405_v17 = vpop.xlane.xlu1 %404 }
 0x4a3   : > { %v406_v48 = vadd.f32 %v405_v17, %v402_v15 }
 0x4a5   : > { %408 = vst.msk [vmem:[#allocation3] sm:$0xff] %vm320_vm2, %v406_v48 }
 0x4a6   : > { %v683_v50 = vpop.xlane.xlu0 %682  ;;  %v605_v6 = vpop.permute.xlu1 %604 }
 0x4a7   : > { %v684_v51 = vadd.f32 %v683_v50, %v680_v49  ;;  %v607_v7 = vmul.f32 %v605_v6, %v601_v5 }
 0x4a8   : > { %v894_v52 = vld [vmem:[#allocation3 + $0x8] sm:$0xff] }
 0x4a9   : > { %685 = vst.msk [vmem:[#allocation3 + $0x10] sm:$0xff] %vm320_vm2, %v684_v51  ;;  %1207 = vrcp.f32 %v894_v52 }
 0x4aa   : > { %v740_v14 = vpop.permute.xlu1 %739 }
 0x4ac   : > { %v885_v54 = vld [vmem:[#allocation3] sm:$0xff] }
 0x4ad   : > { %1209 = vrcp.f32 %v885_v54 }
 0x4ae   : > { %v818_v56 = vpop.xlane.xlu0 %817 }
 0x4af   : > { %v819_v57 = vadd.f32 %v818_v56, %v815_v55 }
 0x4b0   : > { %v903_v58 = vld [vmem:[#allocation3 + $0x10] sm:$0xff] }
 0x4b1   : > { %820 = vst.msk [vmem:[#allocation3 + $0x18] sm:$0xff] %vm320_vm2, %v819_v57  ;;  %1211 = vrcp.f32 %v903_v58 }
 0x4b3   : > { %v1208_v59 = vpop.eup %1207 }
 0x4b4   : > { %898 = vperm.xlu0 %1187, %v1208_v59  }
 0x4b6   : > { %v461_v61 = vpop.permute.xlu0 %460 }
 0x4b7   : > { %v1210_v62 = vpop.eup %1209  ;;  %v463_v63 = vmul.f32 %v461_v61, %v457_v60 }
 0x4b8   : > { %889 = vperm.xlu1 %1188, %v1210_v62   ;;  %v912_v1 = vld [vmem:[#allocation3 + $0x18] sm:$0xff] }
 0x4b9   : > { %v464_v2 = vadd.f32 %v463_v63, %v1384_v35  ;;  %1213 = vrcp.f32 %v912_v1  ;;  %v742_v35 = vmul.f32 %v740_v14, %v736_v13 }
 0x4ba   : > { %v875_v24 = vpop.permute.xlu0 %874 }
 0x4bb   : > { %v1212_v3 = vpop.eup %1211  ;;  %465 = vst.msk [vmem:[#allocation4] sm:$0xff] %vm329_vm0, %v464_v2  ;;  %v877_v25 = vmul.f32 %v875_v24, %v871_v23 }
 0x4bc   : > { %907 = vperm.xlu1 %1188, %v1212_v3  }
 0x4c2   : > { %v884_v42 = vld [vmem:[#allocation4] sm:$0xff] }
 0x4c3   : > { %v1214_v4 = vpop.eup %1213 }
 0x4c4   : > { %916 = vperm.xlu0 %1187, %v1214_v4  }
 0x4ec   : > { %v594_v8 = vpop.f32.mrb[4].mxu0 }
 0x4ed   : > { %v608_v9 = vadd.f32 %v607_v7, %v594_v8  ;;  %v1127_v10 = vpop.f32.mrb[5].mxu0 }
 0x4ee   : > { %v597_v11 = vpop.f32.mrb[6].mxu0 }
 0x4ef   : > { %609 = vst.msk [vmem:[#allocation4 + $0x8] sm:$0xff] %vm329_vm0, %v608_v9  ;;  %v1128_v12 = vpop.f32.mrb[7].mxu0 }
 0x4f4   : > { %v729_v16 = vpop.f32.mrb[8].mxu0 }
 0x4f5   : > { %v743_v19 = vadd.f32 %v742_v35, %v729_v16  ;;  %v1139_v20 = vpop.f32.mrb[9].mxu0 }
 0x4f6   : > { %v732_v21 = vpop.f32.mrb[10].mxu0  ;;  %v893_v32 = vld [vmem:[#allocation4 + $0x8] sm:$0xff] }
 0x4f7   : > { %744 = vst.msk [vmem:[#allocation4 + $0x10] sm:$0xff] %vm329_vm0, %v743_v19  ;;  %v1140_v22 = vpop.f32.mrb[11].mxu0 }
 0x4fc   : > { %v864_v27 = vpop.f32.mrb[12].mxu0 }
 0x4fd   : > { %v878_v28 = vadd.f32 %v877_v25, %v864_v27  ;;  %v1151_v29 = vpop.f32.mrb[13].mxu0 }
 0x4fe   : > { %v867_v30 = vpop.f32.mrb[14].mxu0  ;;  %v902_v37 = vld [vmem:[#allocation4 + $0x10] sm:$0xff] }
 0x4ff   : > { %879 = vst.msk [vmem:[#allocation4 + $0x18] sm:$0xff] %vm329_vm0, %v878_v28  ;;  %v1152_v26 = vpop.f32.mrb[15].mxu0 }
 0x506   : > { %v911_v40 = vld [vmem:[#allocation4 + $0x18] sm:$0xff] }
 0x533   : > { %v899_v31 = vpop.permute.xlu0 %898 }
 0x534   : > { %v901_v33 = vmul.f32 %v899_v31, %v893_v32 }
 0x536   : > { %921 = vrot.lane.b32.xlu1 %v901_v33, %s1246_s8 }
 0x537   : > { %v890_v34 = vpop.permute.xlu1 %889 }
 0x538   : > { %v892_v44 = vmul.f32 %v890_v34, %v884_v42 }
 0x53b   : > { %v908_v36 = vpop.permute.xlu1 %907 }
 0x53c   : > { %v910_v38 = vmul.f32 %v908_v36, %v902_v37 }
 0x53e   : > { %925 = vrot.lane.b32.xlu0 %v910_v38, %s1247_s9 }
 0x543   : > { %v917_v39 = vpop.permute.xlu0 %916 }
 0x544   : > { %v919_v41 = vmul.f32 %v917_v39, %v911_v40 }
 0x546   : > { %929 = vrot.lane.b32.xlu1 %v919_v41, %s1248_s10 }
 0x5a8   : > { %v922_v43 = vpop.permute.xlu1 %921 }
 0x5a9   : > { %v932_v45 = vsel %vm329_vm0, %v892_v44, %v922_v43 }
 0x5b0   : > { %v926_v0 = vpop.permute.xlu0 %925 }
 0x5b1   : > { %v934_v46 = vsel %vm933_vm4, %v932_v45, %v926_v0 }
 0x5b8   : > { %v930_v47 = vpop.permute.xlu1 %929 }
 0x5b9   : > { %v936_v15 = vsel %vm935_vm5, %v934_v46, %v930_v47 }
 0x5ba   : > { %v937_v17 = vpack.c.bf16 %v936_v15, %v936_v15 }
 0x5bc   : > { %939 = vst.msk [vmem:[%s314_s13] sm:$0xf] %vm938_vm6, %v937_v17 }
 0x5bd PF: > { %s14_s17 = sadd.s32 1, %s1237_s17   ;;  %s1448_s15 = smov %s1233_s16 }
 0x5be   : > { %p11_p5 = scmp.ge.s32.totalorder %s14_s17, 4   ;;  %s1449_s16 = smov %s1451_s18 }
 0x5c0   :  { %13 = sbr.rel (!%p11_p5) target bundleno = 2 (0x2), region = 92 }

// kernel: encoder_layer_forward.7
= control target key start
LH: loop header
LB: loop body
LE: loop exit
PB: predicated region body
PF: predicated region fallthrough
CT: control target
= control target key end

     0   :  { %s649_s24 = smov 0   ;;  %s714_s0 = inlined_call_operand.vmem [shape: f32[16,32], index: 0, kind: input, shape index: {}]   ;;  %s715_s1 = inlined_call_operand.vmem [shape: bf16[64,32], index: 1, kind: input, shape index: {}]   ;;  %s716_s2 = inlined_call_operand.vmem [shape: f32[1,64], index: 2, kind: input, shape index: {}]   ;;  %s717_s3 = inlined_call_operand.vmem [shape: bf16[32,64], index: 3, kind: input, shape index: {}]   ;;  %s718_s4 = inlined_call_operand.vmem [shape: f32[1,32], index: 4, kind: input, shape index: {}]   ;;  %s719_s5 = inlined_call_operand.vmem [shape: f32[1,32], index: 5, kind: input, shape index: {}]   ;;  %s720_s6 = inlined_call_operand.vmem [shape: f32[1,32], index: 6, kind: input, shape index: {}]   ;;  %s721_s7 = inlined_call_operand.vmem [shape: f32[16,32], index: 7, kind: output, shape index: {}]  }
   0x1 LB: > { %s530_s25 = sadd.s32 4294967295, %s605_s24   ;;  %p534_p0 = scmp.ge.s32.totalorder %s605_s24, 1  ;;  %s605_s24 = sphi %s649_s24, %s17_s24  }
   0x2   : > { %p236_p1 = scmp.lt.s32.totalorder %s605_s24, 3 }
   0x4   : > { %p237_p2 = pnand %p534_p0, %p236_p1 }
   0x5   : > { %v589_v0 = vld [vmem:[%s715_s1] sm:$0xff] (!%p237_p2)   ;;  %v607_v1 = vmov (!%p237_p2), 0.0   ;;  %vm312_vm0 = vcmask (!%p237_p2), 261120   ;;  %v590_v3 = vld [vmem:[%s715_s1 + $0x8] sm:$0xff] (!%p237_p2)   ;;  %vm608_vm1 = vmmov (!%p237_p2), 0   ;;  %v591_v5 = vld [vmem:[%s715_s1 + $0x10] sm:$0xff] (!%p237_p2)  }
   0x6   : > { %240 = sbr.rel (%p237_p2) target bundleno = 801 (0x321), region = 48  ;;  %559 = vmatprep.subr.bf16.mxu0 (!%p237_p2), %v607_v1  ;;  %571 = vmatprep.subr.bf16.mxu1 (!%p237_p2), %v607_v1  ;;  %v317_v2 = vsel (!%p237_p2), %vm312_vm0, %v589_v0, 0  ;;  %v320_v4 = vsel (!%p237_p2), %vm312_vm0, %v590_v3, 0  ;;  %p266_p3 = scmp.lt.s32.totalorder (!%p237_p2), %s530_s25, 1  ;;  %v323_v6 = vsel (!%p237_p2), %vm312_vm0, %v591_v5, 0  ;;  %v592_v7 = vld [vmem:[%s715_s1 + $0x18] sm:$0xff] (!%p237_p2)  }
   0x7   : > { %560 = vmatpush3.bf16.xpose.msra.mxu0 (!%p237_p2), %v317_v2  ;;  %567 = vmatprep.mubr.msk.bf16.mxu0 (!%p237_p2), %vm608_vm1, %v607_v1  ;;  %v326_v8 = vsel (!%p237_p2), %vm312_vm0, %v592_v7, 0  ;;  %v593_v11 = vld [vmem:[%s717_s3] sm:$0xff] (!%p237_p2)   ;;  %vm395_vm2 = vcmask (!%p237_p2), 523264   ;;  %v594_v13 = vld [vmem:[%s717_s3 + $0x8] sm:$0xff] (!%p237_p2)  }
   0x8   : > { %561 = vmatprep.subr.bf16.mxu0 (!%p237_p2), %v607_v1  ;;  %575 = vmatprep.mubr.msk.bf16.mxu1 (!%p237_p2), %vm608_vm1, %v607_v1  ;;  %v400_v12 = vsel (!%p237_p2), %vm395_vm2, %v593_v11, 0  ;;  %v403_v14 = vsel (!%p237_p2), %vm395_vm2, %v594_v13, 0  ;;  %v537_v15 = vld [vmem:[%s716_s2] ss:$0 sm:$0xff] (!%p237_p2) }
   0x9   : > { %572 = vmatpush3.bf16.xpose.msra.mxu1 (!%p237_p2), %v400_v12  ;;  %v543_v27 = vld [vmem:[%s718_s4] ss:$0 sm:$0xff] (!%p237_p2) }
   0xa   : > { %573 = vmatprep.subr.bf16.mxu1 (!%p237_p2), %v607_v1  ;;  %v547_v44 = vld [vmem:[%s719_s5] ss:$0 sm:$0xff] (!%p237_p2) }
   0xb   : > { %v548_v46 = vld [vmem:[%s720_s6] ss:$0 sm:$0xff] (!%p237_p2) }
   0xd   : > { %s723_s25 = smov (!%p266_p3, %s530_s25), 1 }
   0xe   : > { %s535_s11 = sshll.u32 %s723_s25, 3 }
   0xf   : > { %562 = vmatpush3.bf16.xpose.msra.mxu0 %v320_v4  ;;  %s269_s14 = scalar_lea.vmem %s714_s0, %s535_s11  ;;  %s273_s8 = scalar_lea.vmem %s721_s7, %s535_s11 }
  0x10   : > { %563 = vmatprep.subr.bf16.mxu0 %v607_v1  ;;  %v275_v9 = vld [vmem:[%s269_s14] sm:$0xff] }
  0x11   : > { %v284_v10 = vpack.c.bf16 %v275_v9, %v275_v9  ;;  %574 = vmatpush3.bf16.xpose.msra.mxu1 %v403_v14 }
  0x17   : > { %564 = vmatpush3.bf16.xpose.msra.mxu0 %v323_v6 }
  0x18   : > { %565 = vmatprep.subr.bf16.mxu0 %v607_v1 }
  0x1f   : > { %566 = vmatpush3.bf16.xpose.msra.mxu0 %v326_v8 }
  0x26   : > { %568 = vmatmul.mubr.msk.bf16.vlgmr.msra.gmra.mrb[0].mxu0 %vm312_vm0, %v284_v10 }
  0xf9   : > { %v362_v16 = vpop.f32.mrb[0].mxu0 }
  0xfa   : > { %v363_v17 = vadd.f32 %v537_v15, %v362_v16  ;;  %v569_v18 = vpop.f32.mrb[1].mxu0 }
  0xfb   : > { %v365_v19 = vpop.f32.mrb[2].mxu0 }
  0xfc   : > { %v369_v20 = vmul.f32 0.70710677, %v363_v17  ;;  %v570_v21 = vpop.f32.mrb[3].mxu0  ;;  %v368_v23 = vmul.f32 0.5, %v363_v17 }
  0xfe   : > { %595 = verf.f32 %v369_v20 }
 0x108   : > { %v596_v22 = vpop.eup %595 }
 0x109   : > { %v371_v24 = vadd.f32 1.0, %v596_v22 }
 0x10b   : > { %v372_v25 = vmul.f32 %v371_v24, %v368_v23 }
 0x10d   : > { %v377_v26 = vpack.c.bf16 %v372_v25, %v372_v25 }
 0x10f   : > { %576 = vmatmul.mubr.msk.bf16.vlgmr.msra.gmra.mrb[0].mxu1 %vm395_vm2, %v377_v26 }
 0x1e2   : > { %v439_v28 = vpop.f32.mrb[0].mxu1 }
 0x1e3   : > { %v440_v29 = vadd.f32 %v543_v27, %v439_v28  ;;  %v577_v30 = vpop.f32.mrb[1].mxu1 }
 0x1e4   : > { %v442_v31 = vpop.f32.mrb[2].mxu1 }
 0x1e5   : > { %v578_v32 = vpop.f32.mrb[3].mxu1  ;;  %v445_v33 = vadd.f32 %v440_v29, %v275_v9 }
 0x1e7   : > { %v448_v34 = vsel %vm312_vm0, %v445_v33, 0.0 }
 0x1e8   : > { %449 = vadd.xlane.f32.xlu0 %v448_v34 }
 0x275   : > { %v450_v35 = vpop.xlane.xlu0 %449 }
 0x276   : > { %v452_v36 = vmul.f32 0.03125, %v450_v35 }
 0x278   : > { %v453_v37 = vsub.f32 %v445_v33, %v452_v36 }
 0x27a   : > { %v454_v38 = vmul.f32 %v453_v37, %v453_v37 }
 0x27c   : > { %v455_v39 = vsel %vm312_vm0, %v454_v38, 0.0 }
 0x27d   : > { %456 = vadd.xlane.f32.xlu0 %v455_v39 }
 0x30a   : > { %v457_v40 = vpop.xlane.xlu0 %456 }
 0x30b   : > { %v458_v41 = vmul.f32 0.03125, %v457_v40 }
 0x30d   : > { %v459_v42 = vadd.f32 1e-05, %v458_v41 }
 0x30f   : > { %597 = vrsqrt.f32 %v459_v42 }
 0x319   : > { %v598_v43 = vpop.eup %597 }
 0x31a   : > { %v461_v45 = vmul.f32 %v598_v43, %v453_v37 }
 0x31c   : > { %v468_v47 = vmul.f32 %v547_v44, %v461_v45 }
 0x31e   : > { %v475_v48 = vadd.f32 %v548_v46, %v468_v47 }
 0x320   : > { %476 = vst.msk [vmem:[%s273_s8] sm:$0xff] %vm312_vm0, %v475_v48 }
 0x321 PF: > { %s17_s24 = sadd.s32 1, %s605_s24  }
 0x322   : > { %p14_p4 = scmp.ge.s32.totalorder %s17_s24, 4  }
 0x324   :  { %16 = sbr.rel (!%p14_p4) target bundleno = 1 (0x1), region = 78 }

</bundles_post_ra>
